<compile_context>
chip_gen: v7x
topology: tpu7x:2x2x1
jax: 0.10.0
libtpu: 0.0.40
codegen_flags: <defaults>
</compile_context>

<pallas_src>
import functools
import math

import jax
import jax.numpy as jnp
from jax.experimental import pallas as pl
from jax.experimental.pallas import tpu as pltpu


# ---------------------------------------------------------------------------
# in-kernel layout helpers (lane-aware relayout when available)
# ---------------------------------------------------------------------------
def _heads_to_front(t):
    """(M, H, Dh) -> (H, M, Dh)."""
    if hasattr(pltpu, "einshape"):
        return pltpu.einshape("mhd->hmd", t)
    return jnp.swapaxes(t, 0, 1)          # fallback for older jax versions


def _heads_to_back(t):
    """(H, M, Dh) -> (M, H, Dh)."""
    if hasattr(pltpu, "einshape"):
        return pltpu.einshape("hmd->mhd", t)
    return jnp.swapaxes(t, 0, 1)


# ---------------------------------------------------------------------------
# kernel
# ---------------------------------------------------------------------------
def _mha_kernel(x_ref, wqkv_ref, bqkv_ref, wo_ref, bo_ref, cos_ref, sin_ref,
                o_ref, *, num_heads, head_dim, batch_block, seq_len):
    D = num_heads * head_dim
    M = batch_block * seq_len                       # rows fed to the MXU per step

    # Flatten the batch block so both projections see M = batch_block*seq rows
    # (fills the MXU M dimension instead of S=8 rows per pass).
    x = x_ref[...].reshape(M, D)                    # (M, D) bf16

    # ---- fused QKV projection: one MXU pass with N = 3D (bf16 in, f32 acc) ----
    qkv = jnp.dot(x, wqkv_ref[...],
                  preferred_element_type=jnp.float32) + bqkv_ref[...]   # (M, 3D) f32

    q = qkv[:, :D]                                  # lane-aligned slices
    k = qkv[:, D:2 * D]
    v = qkv[:, 2 * D:]

    # ---- RoPE (fp32): rotate-half via XLU roll; sign folded into sin table ----
    cos = cos_ref[...]                              # (M, D) f32 (tiled per batch row)
    sin_s = sin_ref[...]                            # (M, D) f32, [-sin | +sin]

    def rope(t):
        # shift == D/2 exactly, so pltpu.roll direction is immaterial here.
        return t * cos + pltpu.roll(t, shift=D // 2, axis=1) * sin_s

    q = rope(q)    # 1/sqrt(d_k) was pre-folded into W_q / b_q (RoPE is linear)
    k = rope(k)

    # ---- head split: (M, D) -> (H*Bblk, S, Dh); heads lead so the attention
    #      einsums need no further operand transposition ----
    def split_heads(t):
        th = _heads_to_front(t.reshape(M, num_heads, head_dim))   # (H, M, Dh)
        return th.reshape(num_heads * batch_block, seq_len, head_dim)

    qh = split_heads(q).astype(jnp.bfloat16)
    kh = split_heads(k).astype(jnp.bfloat16)
    vh = split_heads(v).astype(jnp.bfloat16)

    # scores: contract last dims directly (no explicit k^T), batched over (h, b)
    scores = jnp.einsum("nqd,nkd->nqk", qh, kh,
                        preferred_element_type=jnp.float32)       # (H*Bblk, S, S)

    # softmax in fp32 (v5e has no bf16 VPU/EUP); denominator via EUP reciprocal
    m = jnp.max(scores, axis=-1, keepdims=True)
    p = jnp.exp(scores - m)
    l = jnp.sum(p, axis=-1, keepdims=True)
    attn = p * pl.reciprocal(l, approx=True)

    vals = jnp.einsum("nqk,nkd->nqd", attn.astype(jnp.bfloat16), vh,
                      preferred_element_type=jnp.float32)         # (H*Bblk, S, Dh)

    # merge heads back to (M, D) and apply the fused output projection
    vals = _heads_to_back(vals.reshape(num_heads, M, head_dim)).reshape(M, D)
    out = jnp.dot(vals.astype(jnp.bfloat16), wo_ref[...],
                  preferred_element_type=jnp.float32) + bo_ref[...]     # (M, D) f32

    o_ref[...] = out.reshape(batch_block, seq_len, D).astype(o_ref.dtype)


# ---------------------------------------------------------------------------
# host-side prep (hoisted out of the per-call path)
# ---------------------------------------------------------------------------
def _rope_tables(seq_len, d_model):
    """cos/sin tables (fp32) for rotate-half RoPE over the full d_model."""
    half = d_model // 2
    inv_freq = 1.0 / (10000.0 ** (jnp.arange(0, half, dtype=jnp.float32) * 2.0 / d_model))
    pos = jnp.arange(seq_len, dtype=jnp.float32)
    angles = pos[:, None] * inv_freq[None, :]                     # (S, D/2)
    cos = jnp.concatenate([jnp.cos(angles), jnp.cos(angles)], axis=-1)
    sin = jnp.concatenate([jnp.sin(angles), jnp.sin(angles)], axis=-1)
    return cos, sin                                               # fp32 (S, D)


def prepare_params(params, num_heads, seq_len, batch_block):
    """Fuse + transpose + bf16-cast the projection weights, fold the 1/sqrt(d_k)
    attention scale into W_q/b_q, and precompute (batch-block-tiled) RoPE tables."""
    d_model = params["wq"].shape[0]
    head_dim = d_model // num_heads
    half = d_model // 2
    scale = 1.0 / math.sqrt(head_dim)

    # nn.Linear computes x @ W^T + b; store W^T so the kernel does a plain matmul.
    w_qkv_t = jnp.concatenate(
        [params["wq"].T * scale, params["wk"].T, params["wv"].T], axis=1
    ).astype(jnp.bfloat16)                                        # (D, 3D)
    b_qkv = jnp.concatenate(
        [params["bq"] * scale, params["bk"], params["bv"]]
    ).reshape(1, 3 * d_model).astype(jnp.float32)                 # (1, 3D)
    wo_t = params["wo"].T.astype(jnp.bfloat16)                    # (D, D)
    bo = params["bo"].reshape(1, d_model).astype(jnp.float32)     # (1, D)

    cos, sin = _rope_tables(seq_len, d_model)                     # keep tables fp32
    # fold the rotate-half sign into the sin table: rot(t) = roll(t, D/2) * sign
    sin_signed = jnp.concatenate([-sin[:, :half], sin[:, half:]], axis=-1)
    # tile per-position tables across the batch block so RoPE stays a pure
    # (M, D) elementwise op on the flattened rows (row order = (b, s)).
    cos = jnp.tile(cos, (batch_block, 1))
    sin_signed = jnp.tile(sin_signed, (batch_block, 1))
    return {"w_qkv_t": w_qkv_t, "b_qkv": b_qkv, "wo_t": wo_t, "bo": bo,
            "cos": cos, "sin_signed": sin_signed}


def _pick_batch_block(batch, seq, target_rows=256):
    """Largest divisor of `batch` whose flattened rows fit the MXU M target,
    while keeping >=2 grid steps when batch > 1 (so both v7x TensorCores get
    work and the BlockSpec pipeline has more than one step)."""
    best = 1
    for cand in range(1, batch + 1):
        if batch % cand == 0 and cand * seq <= target_rows and (cand < batch or batch == 1):
            best = cand
    return best


def _const_spec(shape):
    """BlockSpec for a grid-invariant operand; single-buffered when supported."""
    index_map = lambda *_: (0,) * len(shape)
    buffered = getattr(pl, "Buffered", None)
    if buffered is not None:
        try:
            return pl.BlockSpec(shape, index_map, pipeline_mode=buffered(1))
        except TypeError:
            pass
    return pl.BlockSpec(shape, index_map)


def _vmem_limit_bytes(batch_block, seq, d_model, num_heads):
    """Tile-derived scoped-VMEM limit: block buffers + generous slack for
    compiler temporaries, floored at 16 MiB and kept ~15% under v7x's 64 MiB
    physical VMEM (v5e/v6e have 128 MiB, so the cap is always safe)."""
    f32, bf16 = 4, 2
    M = batch_block * seq
    head_dim = d_model // num_heads
    blocks = (
        2 * M * d_model * bf16                        # x block, double-buffered
        + 2 * M * d_model * bf16                      # out block, double-buffered
        + d_model * 3 * d_model * bf16                # fused W_qkv^T (single-buffered)
        + d_model * d_model * bf16                    # W_o^T
        + 8 * 4 * d_model * f32                       # biases (sublane-padded)
        + 2 * M * d_model * f32                       # cos + signed-sin tables
    )
    temps = (
        M * 3 * d_model * f32                         # qkv activations
        + 3 * M * d_model * f32                       # q, k, v staging
        + 2 * num_heads * batch_block * seq * seq * f32   # scores + probs
        + num_heads * batch_block * seq * head_dim * f32  # per-head values
        + 2 * M * d_model * f32                       # merged values + out
    )
    need = blocks + 2 * temps + (4 << 20)             # 2x slack + Mosaic scratch
    return int(max(16 << 20, min(need, int(0.85 * (64 << 20)))))


# ---------------------------------------------------------------------------
# wrapper
# ---------------------------------------------------------------------------
def multihead_attention_pallas(x, prep, num_heads):
    B, S, D = x.shape
    head_dim = D // num_heads
    batch_block = prep["cos"].shape[0] // S           # tables were tiled for this block
    assert B % batch_block == 0, "batch must be divisible by the prepared batch_block"

    kernel = functools.partial(_mha_kernel, num_heads=num_heads, head_dim=head_dim,
                               batch_block=batch_block, seq_len=S)
    return pl.pallas_call(
        kernel,
        out_shape=jax.ShapeDtypeStruct((B, S, D), x.dtype),
        grid=(B // batch_block,),
        in_specs=[
            pl.BlockSpec((batch_block, S, D), lambda b: (b, 0, 0)),   # x (bf16)
            _const_spec((D, 3 * D)),                  # fused W_qkv^T (bf16, 1-buffered)
            _const_spec((1, 3 * D)),                  # fused b_qkv (f32)
            _const_spec((D, D)),                      # W_o^T (bf16)
            _const_spec((1, D)),                      # b_o (f32)
            _const_spec((batch_block * S, D)),        # cos table (f32)
            _const_spec((batch_block * S, D)),        # signed sin table (f32)
        ],
        out_specs=pl.BlockSpec((batch_block, S, D), lambda b: (b, 0, 0)),
        compiler_params=pltpu.CompilerParams(
            dimension_semantics=("parallel",),        # batch blocks across cores
            vmem_limit_bytes=_vmem_limit_bytes(batch_block, S, D, num_heads),
        ),
    )(x, prep["w_qkv_t"], prep["b_qkv"], prep["wo_t"], prep["bo"],
      prep["cos"], prep["sin_signed"])


# ---------------------------------------------------------------------------
# pure-JAX fp32 reference mirroring the PyTorch forward pass
# ---------------------------------------------------------------------------
def multihead_attention_ref(x, params, num_heads):
    B, S, D = x.shape
    head_dim = D // num_heads
    half = D // 2
    cos, sin = _rope_tables(S, D)

    def linear(t, w, b):
        return t @ w.T + b

    q = linear(x, params["wq"], params["bq"])
    k = linear(x, params["wk"], params["bk"])
    v = linear(x, params["wv"], params["bv"])

    def rope(t):
        rot = jnp.concatenate([-t[..., half:], t[..., :half]], axis=-1)
        return t * cos + rot * sin

    q = rope(q)
    k = rope(k)

    def split(t):
        return t.reshape(B, S, num_heads, head_dim).transpose(0, 2, 1, 3)

    qh, kh, vh = split(q), split(k), split(v)
    scores = jnp.einsum("bhqd,bhkd->bhqk", qh, kh) / math.sqrt(head_dim)
    attn = jax.nn.softmax(scores, axis=-1)
    vals = jnp.einsum("bhqk,bhkd->bhqd", attn, vh)
    vals = vals.transpose(0, 2, 1, 3).reshape(B, S, D)
    return linear(vals, params["wo"], params["bo"])


def init_params(key, d_model):
    ks = jax.random.split(key, 8)
    bound = 1.0 / math.sqrt(d_model)

    def u(k, shape):
        return jax.random.uniform(k, shape, jnp.float32, -bound, bound)

    return {
        "wq": u(ks[0], (d_model, d_model)), "bq": u(ks[1], (d_model,)),
        "wk": u(ks[2], (d_model, d_model)), "bk": u(ks[3], (d_model,)),
        "wv": u(ks[4], (d_model, d_model)), "bv": u(ks[5], (d_model,)),
        "wo": u(ks[6], (d_model, d_model)), "bo": u(ks[7], (d_model,)),
    }


if __name__ == "__main__":
    key = jax.random.PRNGKey(0)
    k_x, k_p = jax.random.split(key)

    # d_model = 128 keeps every last dim lane-dense (multiple of 128).
    batch, seq, d_model, num_heads = 4, 8, 128, 4
    x = jax.random.normal(k_x, (batch, seq, d_model), dtype=jnp.float32)
    params = init_params(k_p, d_model)

    # Batch-block size: flatten batch_block*seq rows per grid step (fills the MXU
    # M dim) while keeping >=2 parallel grid steps for v7x's two TensorCores.
    batch_block = _pick_batch_block(batch, seq)        # -> 2, grid = (2,)
    prep = prepare_params(params, num_heads, seq, batch_block)

    # bf16 activations in/out: halves HBM traffic; MXU consumes bf16 anyway.
    x_bf16 = x.astype(jnp.bfloat16)
    out = multihead_attention_pallas(x_bf16, prep, num_heads)
    out = jax.block_until_ready(out)

    ref = multihead_attention_ref(x, params, num_heads)
    assert out.shape == (batch, seq, d_model)
    # Tolerance accounts for bf16 MXU operands / bf16 output vs the fp32 reference
    # and the EUP approx reciprocal in the softmax denominator.
    assert jnp.allclose(out.astype(jnp.float32), ref, atol=5e-2, rtol=5e-2), \
        "mismatch vs reference"

    print("KERNEL_OK")
</pallas_src>

<mosaic_0001>
module attributes {stable_mosaic.version = 11 : i64} {
  func.func @_mha_kernel(%arg0: i32, %arg1: memref<2x8x128xbf16, #tpu.memory_space<vmem>>, %arg2: memref<128x384xbf16, #tpu.memory_space<vmem>>, %arg3: memref<1x384xf32, #tpu.memory_space<vmem>>, %arg4: memref<128x128xbf16, #tpu.memory_space<vmem>>, %arg5: memref<1x128xf32, #tpu.memory_space<vmem>>, %arg6: memref<16x128xf32, #tpu.memory_space<vmem>>, %arg7: memref<16x128xf32, #tpu.memory_space<vmem>>, %arg8: memref<2x8x128xbf16, #tpu.memory_space<vmem>>) attributes {dimension_semantics = [#tpu.dimension_semantics<parallel>], iteration_bounds = array<i64: 2>, scalar_prefetch = 0 : i64, scratch_operands = 0 : i64, tpu.core_type = #tpu.core_type<tc>, window_params = [{transform_indices = @transform_0, window_bounds = array<i64: 2, 8, 128>}, {pipeline_mode = #tpu.pipeline_mode<synchronous>, transform_indices = @transform_1, window_bounds = array<i64: 128, 384>}, {pipeline_mode = #tpu.pipeline_mode<synchronous>, transform_indices = @transform_2, window_bounds = array<i64: 1, 384>}, {pipeline_mode = #tpu.pipeline_mode<synchronous>, transform_indices = @transform_3, window_bounds = array<i64: 128, 128>}, {pipeline_mode = #tpu.pipeline_mode<synchronous>, transform_indices = @transform_4, window_bounds = array<i64: 1, 128>}, {pipeline_mode = #tpu.pipeline_mode<synchronous>, transform_indices = @transform_5, window_bounds = array<i64: 16, 128>}, {pipeline_mode = #tpu.pipeline_mode<synchronous>, transform_indices = @transform_6, window_bounds = array<i64: 16, 128>}, {transform_indices = @transform_7, window_bounds = array<i64: 2, 8, 128>}]} {
    %c0 = arith.constant 0 : index
    %c0_0 = arith.constant 0 : index
    %c0_1 = arith.constant 0 : index
    %0 = vector.load %arg1[%c0, %c0_0, %c0_1] : memref<2x8x128xbf16, #tpu.memory_space<vmem>>, vector<2x8x128xbf16>
    %1 = vector.shape_cast %0 : vector<2x8x128xbf16> to vector<16x128xbf16>
    %c0_2 = arith.constant 0 : index
    %c0_3 = arith.constant 0 : index
    %2 = vector.load %arg2[%c0_2, %c0_3] : memref<128x384xbf16, #tpu.memory_space<vmem>>, vector<128x384xbf16>
    %cst = arith.constant dense<0.000000e+00> : vector<16x384xf32>
    %3 = tpu.matmul %1, %2, %cst {dimension_numbers = #tpu.dot_dimension_numbers<[1], [0], [0], [1], [0, 0, 1, 1], [], []>} : vector<16x128xbf16>, vector<128x384xbf16>, vector<16x384xf32> -> vector<16x384xf32>
    %c0_4 = arith.constant 0 : index
    %c0_5 = arith.constant 0 : index
    %4 = vector.load %arg3[%c0_4, %c0_5] : memref<1x384xf32, #tpu.memory_space<vmem>>, vector<1x384xf32>
    %5 = vector.broadcast %4 : vector<1x384xf32> to vector<16x384xf32>
    %6 = arith.addf %3, %5 : vector<16x384xf32>
    %7 = vector.extract_strided_slice %6 {offsets = [0, 0], sizes = [16, 128], strides = [1, 1]} : vector<16x384xf32> to vector<16x128xf32>
    %8 = vector.extract_strided_slice %6 {offsets = [0, 128], sizes = [16, 128], strides = [1, 1]} : vector<16x384xf32> to vector<16x128xf32>
    %9 = vector.extract_strided_slice %6 {offsets = [0, 256], sizes = [16, 128], strides = [1, 1]} : vector<16x384xf32> to vector<16x128xf32>
    %c0_6 = arith.constant 0 : index
    %c0_7 = arith.constant 0 : index
    %10 = vector.load %arg6[%c0_6, %c0_7] : memref<16x128xf32, #tpu.memory_space<vmem>>, vector<16x128xf32>
    %c0_8 = arith.constant 0 : index
    %c0_9 = arith.constant 0 : index
    %11 = vector.load %arg7[%c0_8, %c0_9] : memref<16x128xf32, #tpu.memory_space<vmem>>, vector<16x128xf32>
    %12 = arith.mulf %7, %10 : vector<16x128xf32>
    %c64_i32 = arith.constant 64 : i32
    %13 = tpu.dynamic_rotate %7 by %c64_i32 dim 1 : vector<16x128xf32>, i32 -> vector<16x128xf32>
    %14 = arith.mulf %13, %11 : vector<16x128xf32>
    %15 = arith.addf %12, %14 : vector<16x128xf32>
    %16 = arith.mulf %8, %10 : vector<16x128xf32>
    %c64_i32_10 = arith.constant 64 : i32
    %17 = tpu.dynamic_rotate %8 by %c64_i32_10 dim 1 : vector<16x128xf32>, i32 -> vector<16x128xf32>
    %18 = arith.mulf %17, %11 : vector<16x128xf32>
    %19 = arith.addf %16, %18 : vector<16x128xf32>
    %20 = vector.shape_cast %15 : vector<16x128xf32> to vector<16x4x32xf32>
    %21 = tpu.transpose %20, [1, 0, 2] : vector<16x4x32xf32> -> vector<4x16x32xf32>
    %22 = vector.shape_cast %21 : vector<4x16x32xf32> to vector<8x8x32xf32>
    %23 = arith.truncf %22 : vector<8x8x32xf32> to vector<8x8x32xbf16>
    %24 = vector.shape_cast %19 : vector<16x128xf32> to vector<16x4x32xf32>
    %25 = tpu.transpose %24, [1, 0, 2] : vector<16x4x32xf32> -> vector<4x16x32xf32>
    %26 = vector.shape_cast %25 : vector<4x16x32xf32> to vector<8x8x32xf32>
    %27 = arith.truncf %26 : vector<8x8x32xf32> to vector<8x8x32xbf16>
    %28 = vector.shape_cast %9 : vector<16x128xf32> to vector<16x4x32xf32>
    %29 = tpu.transpose %28, [1, 0, 2] : vector<16x4x32xf32> -> vector<4x16x32xf32>
    %30 = vector.shape_cast %29 : vector<4x16x32xf32> to vector<8x8x32xf32>
    %31 = arith.truncf %30 : vector<8x8x32xf32> to vector<8x8x32xbf16>
    "tpu.trace_start"() <{level = 10 : i32, message = "nqd,nkd->nqk"}> : () -> ()
    %cst_11 = arith.constant dense<0.000000e+00> : vector<8x8x8xf32>
    %32 = tpu.matmul %23, %27, %cst_11 {dimension_numbers = #tpu.dot_dimension_numbers<[2], [2], [1], [1], [0, 0, 0, 1, 1, 1], [0], [0]>} : vector<8x8x32xbf16>, vector<8x8x32xbf16>, vector<8x8x8xf32> -> vector<8x8x8xf32>
    "tpu.trace_stop"() : () -> ()
    %cst_12 = arith.constant dense<0xFF800000> : vector<8x8xf32>
    %33 = vector.multi_reduction <maximumf>, %32, %cst_12 [2] : vector<8x8x8xf32> to vector<8x8xf32>
    %34 = vector.shape_cast %33 : vector<8x8xf32> to vector<8x8x1xf32>
    %35 = vector.broadcast %34 : vector<8x8x1xf32> to vector<8x8x8xf32>
    %36 = arith.subf %32, %35 : vector<8x8x8xf32>
    %37 = math.exp %36 : vector<8x8x8xf32>
    %cst_13 = arith.constant dense<0.000000e+00> : vector<8x8xf32>
    %38 = vector.multi_reduction <add>, %37, %cst_13 [2] : vector<8x8x8xf32> to vector<8x8xf32>
    %39 = vector.shape_cast %38 : vector<8x8xf32> to vector<8x8x1xf32>
    %40 = tpu.reciprocal %39 {approx = true} : vector<8x8x1xf32> -> vector<8x8x1xf32>
    %41 = vector.broadcast %40 : vector<8x8x1xf32> to vector<8x8x8xf32>
    %42 = arith.mulf %37, %41 : vector<8x8x8xf32>
    %43 = arith.truncf %42 : vector<8x8x8xf32> to vector<8x8x8xbf16>
    "tpu.trace_start"() <{level = 10 : i32, message = "nqk,nkd->nqd"}> : () -> ()
    %cst_14 = arith.constant dense<0.000000e+00> : vector<8x8x32xf32>
    %44 = tpu.matmul %43, %31, %cst_14 {dimension_numbers = #tpu.dot_dimension_numbers<[2], [1], [1], [2], [0, 0, 0, 1, 1, 2], [0], [0]>} : vector<8x8x8xbf16>, vector<8x8x32xbf16>, vector<8x8x32xf32> -> vector<8x8x32xf32>
    "tpu.trace_stop"() : () -> ()
    %45 = vector.shape_cast %44 : vector<8x8x32xf32> to vector<4x16x32xf32>
    %46 = tpu.transpose %45, [1, 0, 2] : vector<4x16x32xf32> -> vector<16x4x32xf32>
    %47 = vector.shape_cast %46 : vector<16x4x32xf32> to vector<16x128xf32>
    %48 = arith.truncf %47 : vector<16x128xf32> to vector<16x128xbf16>
    %c0_15 = arith.constant 0 : index
    %c0_16 = arith.constant 0 : index
    %49 = vector.load %arg4[%c0_15, %c0_16] : memref<128x128xbf16, #tpu.memory_space<vmem>>, vector<128x128xbf16>
    %cst_17 = arith.constant dense<0.000000e+00> : vector<16x128xf32>
    %50 = tpu.matmul %48, %49, %cst_17 {dimension_numbers = #tpu.dot_dimension_numbers<[1], [0], [0], [1], [0, 0, 1, 1], [], []>} : vector<16x128xbf16>, vector<128x128xbf16>, vector<16x128xf32> -> vector<16x128xf32>
    %c0_18 = arith.constant 0 : index
    %c0_19 = arith.constant 0 : index
    %51 = vector.load %arg5[%c0_18, %c0_19] : memref<1x128xf32, #tpu.memory_space<vmem>>, vector<1x128xf32>
    %52 = vector.broadcast %51 : vector<1x128xf32> to vector<16x128xf32>
    %53 = arith.addf %50, %52 : vector<16x128xf32>
    %54 = vector.shape_cast %53 : vector<16x128xf32> to vector<2x8x128xf32>
    %55 = arith.truncf %54 : vector<2x8x128xf32> to vector<2x8x128xbf16>
    %c0_20 = arith.constant 0 : index
    %c0_21 = arith.constant 0 : index
    %c0_22 = arith.constant 0 : index
    %56 = vector.load %arg8[%c0_20, %c0_21, %c0_22] : memref<2x8x128xbf16, #tpu.memory_space<vmem>>, vector<2x8x128xbf16>
    tpu.vector_store %arg8[%c0_20, %c0_21, %c0_22], %55 {strides = array<i32>} : memref<2x8x128xbf16, #tpu.memory_space<vmem>>, vector<2x8x128xbf16>,
    return
  }
  func.func @transform_0(%arg0: i32) -> (i32, i32, i32) {
    %c0_i32 = arith.constant 0 : i32
    %c0_i32_0 = arith.constant 0 : i32
    %c0_i32_1 = arith.constant 0 : i32
    return %arg0, %c0_i32, %c0_i32_0 : i32, i32, i32
  }
  func.func @transform_1(%arg0: i32) -> (i32, i32) {
    %c0_i32 = arith.constant 0 : i32
    %c0_i32_0 = arith.constant 0 : i32
    %c0_i32_1 = arith.constant 0 : i32
    return %c0_i32, %c0_i32_0 : i32, i32
  }
  func.func @transform_2(%arg0: i32) -> (i32, i32) {
    %c0_i32 = arith.constant 0 : i32
    %c0_i32_0 = arith.constant 0 : i32
    %c0_i32_1 = arith.constant 0 : i32
    return %c0_i32, %c0_i32_0 : i32, i32
  }
  func.func @transform_3(%arg0: i32) -> (i32, i32) {
    %c0_i32 = arith.constant 0 : i32
    %c0_i32_0 = arith.constant 0 : i32
    %c0_i32_1 = arith.constant 0 : i32
    return %c0_i32, %c0_i32_0 : i32, i32
  }
  func.func @transform_4(%arg0: i32) -> (i32, i32) {
    %c0_i32 = arith.constant 0 : i32
    %c0_i32_0 = arith.constant 0 : i32
    %c0_i32_1 = arith.constant 0 : i32
    return %c0_i32, %c0_i32_0 : i32, i32
  }
  func.func @transform_5(%arg0: i32) -> (i32, i32) {
    %c0_i32 = arith.constant 0 : i32
    %c0_i32_0 = arith.constant 0 : i32
    %c0_i32_1 = arith.constant 0 : i32
    return %c0_i32, %c0_i32_0 : i32, i32
  }
  func.func @transform_6(%arg0: i32) -> (i32, i32) {
    %c0_i32 = arith.constant 0 : i32
    %c0_i32_0 = arith.constant 0 : i32
    %c0_i32_1 = arith.constant 0 : i32
    return %c0_i32, %c0_i32_0 : i32, i32
  }
  func.func @transform_7(%arg0: i32) -> (i32, i32, i32) {
    %c0_i32 = arith.constant 0 : i32
    %c0_i32_0 = arith.constant 0 : i32
    %c0_i32_1 = arith.constant 0 : i32
    return %arg0, %c0_i32, %c0_i32_0 : i32, i32, i32
  }
}

</mosaic_0001>

<bundles_post_ra>
// kernel: tpu_custom_call.1
= control target key start
LH: loop header
LB: loop body
LE: loop exit
PB: predicated region body
PF: predicated region fallthrough
CT: control target
= control target key end

     0   :  { %s4426_s0 = inlined_call_operand.hbm [shape: bf16[4,8,128], index: 0, kind: input, shape index: {}]   ;;  %s4427_s1 = inlined_call_operand.hbm [shape: bf16[128,384], index: 1, kind: input, shape index: {}]   ;;  %s4428_s2 = inlined_call_operand.hbm [shape: f32[1,384], index: 2, kind: input, shape index: {}]   ;;  %s4429_s3 = inlined_call_operand.hbm [shape: bf16[128,128], index: 3, kind: input, shape index: {}]   ;;  %s4430_s4 = inlined_call_operand.vmem [shape: f32[1,128], index: 4, kind: input, shape index: {}]   ;;  %s4431_s5 = inlined_call_operand.vmem [shape: f32[16,128], index: 5, kind: input, shape index: {}]   ;;  %s4432_s6 = inlined_call_operand.hbm [shape: f32[16,128], index: 6, kind: input, shape index: {}]   ;;  %s4433_s7 = inlined_call_operand.hbm [shape: bf16[4,8,128], index: 7, kind: output, shape index: {}]  }
   0x1   :  { %4437 = sst [smem:[#allocation16_spill]] %s4427_s1 }
   0x2   :  { %12 = vsyncpa [#allocation3], 0 }
   0x3   :  { %14 = vsyncpa [#allocation3 + $0x1], 0 }
   0x4   :  { %15 = vsyncpa [#allocation6], 0 }
   0x5   :  { %16 = vsyncpa [#allocation9], 0 }
   0x6   :  { %17 = vsyncpa [#allocation4], 0 }
   0x7   :  { %19 = vsyncpa [#allocation4 + $0x1], 0  ;;  %s3680_s24 = smov 0   ;;  %s3682_s25 = smov 0  }
   0x8   :  { %s3684_s26 = smov 0   ;;  %s3686_s27 = smov 0  }
   0x9 LB: > { %s3701_s28 = sadd.s32 4294967295, %s3617_s27   ;;  %s2930_s29 = sadd.s32 4294967294, %s3617_s27   ;;  %s3617_s27 = sphi %s3686_s27, %s4458_s27   ;;  %s3613_s26 = sphi %s3684_s26, %s4457_s26   ;;  %s3609_s25 = sphi %s3682_s25, %s4456_s25   ;;  %s3605_s24 = sphi %s3680_s24, %s4455_s24  }
   0xa   : > { %p45_p0 = scmp.ne.s32.totalorder %s3609_s25, %s3605_s24  ;;  %p4434_p1 = scmp.eq.s32.totalorder %s3701_s28, 0 }
   0xb   : > { %p201_p3 = scmp.eq.s32.totalorder %s2930_s29, 1  ;;  %p2931_p5 = scmp.ge.s32.totalorder %s3617_s27, 1 }
   0xc   : > { %p3710_p4 = por %p4434_p1, %p45_p0  ;;  %p208_p7 = scmp.lt.s32.totalorder %s3617_s27, 3 }
   0xd   : > { %p3715_p6 = por %p201_p3, %p45_p0  ;;  %s3619_s10 = smov [#allocation5]  }
   0xe   : > { %s4438_s30 = scalar_select %p3710_p4, 1, 0 }
   0xf   : > { %s4439_s8 = scalar_select %p3715_p6, 1, 0 }
  0x10   : > { %p3720_p8 = pnand %p2931_p5, %p208_p7  ;;  %s220_s11 = sshll.u32 %s3619_s10, 4  ;;  %s3724_s11 = int_to_ptr.vmem [resolvable:$true] %s220_s11 }
  0x11   : > { %s3620_s13 = smov [#allocation8]   ;;  %s4442_s1 = sld [smem:[#allocation16_spill]] }
  0x12   : > { %s4440_s9 = scalar_select %p3720_p8, 1, 0 }
  0x13   : > { %p3231_p9 = pneg %p3720_p8  ;;  %s244_s14 = sshll.u32 %s3620_s13, 4  ;;  %s3735_s14 = int_to_ptr.vmem [resolvable:$true] %s244_s14 }
  0x15   : > { %p3731_p11 = pnand %p3231_p9, %p4434_p1 }
  0x17   : > { %s3401_s17 = scalar_lea.hbm %s4442_s1, 3072  ;;  %p3745_p13 = pneg %p3731_p11 }
  0x18   : > { %p3402_p12 = scmp.ne.s32.totalorder %s4442_s1, %s3401_s17  ;;  %p3408_p5 = scmp.lt.u32.totalorder %s3401_s17, %s4442_s1 }
  0x1a   : > { %p3404_p0 = pnand %p3745_p13, %p3402_p12 }
  0x1c   : > { %p3405_p3 = pneg %p3404_p0 }
  0x1e   : > { %p3410_p7 = pnand %p3408_p5, %p3405_p3 }
  0x20   : > { %3413 = shalt.err (!%p3410_p7)
}
  0x21   : > { %s3414_s23 = scalar_lea.vmem %s3724_s11, 3072  ;;  %p3422_p2 = scmp.lt.s32.totalorder %s3724_s11, %s3724_s11 }
  0x22   : > { %p3415_p9 = scmp.ne.s32.totalorder %s3724_s11, %s3414_s23  ;;  %p3423_p6 = scmp.lt.s32.totalorder %s3414_s23, %s3414_s23 }
  0x24   : > { %p3417_p10 = pnand %p3415_p9, %p3745_p13  ;;  %p3424_p12 = por %p3423_p6, %p3422_p2 }
  0x26   : > { %p3418_p1 = pneg %p3417_p10 }
  0x28   : > { %p3425_p0 = pnand %p3424_p12, %p3418_p1 }
  0x2a   : > { %3428 = shalt.err (!%p3425_p0)
}
  0x2b   : > { %s3621_s29 = smov 192   ;;  %s3622_s10 = smov 12  }
  0x2c   : > { %3234 = dma.hbm_to_vmem [thread:$0]  (!%p3731_p11), %s4442_s1, 3072, %s3724_s11, [#allocation6], %s3621_s29, %s3621_s29, %s3622_s10  }
  0x2d   : > { %s3429_s18 = scalar_lea.hbm %s4429_s3, 1024 }
  0x2e   : > { %p3430_p2 = scmp.ne.s32.totalorder %s4429_s3, %s3429_s18  ;;  %p3436_p10 = scmp.lt.u32.totalorder %s3429_s18, %s4429_s3 }
  0x30   : > { %p3432_p1 = pnand %p3430_p2, %p3745_p13 }
  0x32   : > { %p3433_p6 = pneg %p3432_p1 }
  0x34   : > { %p3438_p3 = pnand %p3436_p10, %p3433_p6 }
  0x36   : > { %3441 = shalt.err (!%p3438_p3)
}
  0x37   : > { %s3442_s11 = scalar_lea.vmem %s3735_s14, 1024  ;;  %p3450_p12 = scmp.lt.s32.totalorder %s3735_s14, %s3735_s14 }
  0x38   : > { %p3443_p5 = scmp.ne.s32.totalorder %s3735_s14, %s3442_s11  ;;  %p3451_p0 = scmp.lt.s32.totalorder %s3442_s11, %s3442_s11 }
  0x3a   : > { %p3445_p7 = pnand %p3443_p5, %p3745_p13  ;;  %p3452_p2 = por %p3451_p0, %p3450_p12 }
  0x3c   : > { %p3446_p9 = pneg %p3445_p7 }
  0x3e   : > { %p3453_p1 = pnand %p3452_p2, %p3446_p9 }
  0x40   : > { %3456 = shalt.err (!%p3453_p1)
}
  0x41   : > { %s3623_s29 = smov 64   ;;  %s3624_s10 = smov 4  }
  0x42   : > { %3240 = dma.hbm_to_vmem [thread:$0]  (!%p3731_p11), %s4429_s3, 1024, %s3735_s14, [#allocation9], %s3623_s29, %s3623_s29, %s3624_s10  }
  0x43   : > { %s3625_s16 = smov [#allocation7]   ;;  %s3626_s18 = smov [#allocation10]  }
  0x44   : > { %s234_s17 = sshll.u32 %s3625_s16, 4  ;;  %s263_s19 = sshll.u32 %s3626_s18, 4  ;;  %s235_s17 = int_to_ptr.vmem [resolvable:$true] %s234_s17  ;;  %s3792_s19 = int_to_ptr.vmem [resolvable:$true] %s263_s19 }
  0x45   : > { %s3457_s23 = scalar_lea.hbm %s4428_s2, 48 }
  0x46   : > { %p3458_p6 = scmp.ne.s32.totalorder %s4428_s2, %s3457_s23  ;;  %p3464_p5 = scmp.lt.u32.totalorder %s3457_s23, %s4428_s2 }
  0x48   : > { %p3460_p10 = pnand %p3458_p6, %p3745_p13 }
  0x4a   : > { %p3461_p3 = pneg %p3460_p10 }
  0x4c   : > { %p3466_p7 = pnand %p3464_p5, %p3461_p3 }
  0x4e   : > { %3469 = shalt.err (!%p3466_p7)
}
  0x4f   : > { %s3470_s15 = scalar_lea.vmem %s235_s17, 48  ;;  %s3477_s16 = scalar_lea.vmem %s235_s17, 64 }
  0x50   : > { %p3471_p9 = scmp.ne.s32.totalorder %s235_s17, %s3470_s15  ;;  %p3478_p2 = scmp.lt.s32.totalorder %s235_s17, %s235_s17 }
  0x51   : > { %p3479_p1 = scmp.lt.s32.totalorder %s3477_s16, %s3470_s15 }
  0x52   : > { %p3473_p12 = pnand %p3471_p9, %p3745_p13 }
  0x53   : > { %p3480_p4 = por %p3479_p1, %p3478_p2 }
  0x54   : > { %p3474_p0 = pneg %p3473_p12 }
  0x56   : > { %p3481_p8 = pnand %p3480_p4, %p3474_p0 }
  0x58   : > { %3484 = shalt.err (!%p3481_p8)
}
  0x59   : > { %3237 = dma.hbm_to_vmem [thread:$0]  (!%p3731_p11), %s4428_s2, 48, %s235_s17, [#allocation6]  }
  0x5a   : > { %s3485_s23 = scalar_lea.hbm %s4432_s6, 256 }
  0x5b   : > { %p3486_p6 = scmp.ne.s32.totalorder %s4432_s6, %s3485_s23  ;;  %p3492_p4 = scmp.lt.u32.totalorder %s3485_s23, %s4432_s6 }
  0x5d   : > { %p3488_p10 = pnand %p3486_p6, %p3745_p13 }
  0x5f   : > { %p3489_p3 = pneg %p3488_p10 }
  0x61   : > { %p3494_p8 = pnand %p3492_p4, %p3489_p3 }
  0x63   : > { %3497 = shalt.err (!%p3494_p8)
}
  0x64   : > { %s3498_s17 = scalar_lea.vmem %s3792_s19, 256  ;;  %p3506_p12 = scmp.lt.s32.totalorder %s3792_s19, %s3792_s19 }
  0x65   : > { %p3499_p5 = scmp.ne.s32.totalorder %s3792_s19, %s3498_s17  ;;  %p3507_p0 = scmp.lt.s32.totalorder %s3498_s17, %s3498_s17 }
  0x67   : > { %p3501_p7 = pnand %p3499_p5, %p3745_p13  ;;  %p3508_p2 = por %p3507_p0, %p3506_p12 }
  0x69   : > { %p3502_p9 = pneg %p3501_p7 }
  0x6b   : > { %p3509_p1 = pnand %p3508_p2, %p3502_p9 }
  0x6d   : > { %3512 = shalt.err (!%p3509_p1)
}
  0x6e   : > { %s3627_s16 = smov 128   ;;  %s3628_s20 = smov 8  }
  0x6f   : > { %3243 = dma.hbm_to_vmem [thread:$0]  (!%p3731_p11), %s4432_s6, 256, %s3792_s19, [#allocation9], %s3627_s16, %s3627_s16, %s3628_s20  }
  0x70   : > { %s3836_s21 = sadd.s32 1, %s3617_s27   ;;  %s32_s23 = sadd.s32 1, %s3613_s26 }
  0x71   : > { %s29_s22 = ssub.s32 %s3617_s27, %s3836_s21  ;;  %p39_p6 = scmp.ne.s32.totalorder %s3613_s26, %s3609_s25 }
  0x72   : > { %p30_p13 = scmp.eq.s32.totalorder %s29_s22, 0  ;;  %p40_p10 = scmp.eq.s32.totalorder %s3617_s27, 0 }
  0x73   : > { %p4444_p4 = scmp.eq.s32.totalorder %s3701_s28, 1  ;;  %p3256_p5 = scmp.lt.s32.totalorder %s3617_s27, 2 }
  0x74   : > { %s3845_s11 = scalar_select %p30_p13, %s3613_s26, %s32_s23  }
  0x75   : > { %p41_p3 = por %p40_p10, %p39_p6  ;;  %p3849_p8 = por %p4444_p4, %p39_p6 }
  0x76   : > { %s277_s12 = sand.u32 1, %s3613_s26   ;;  %s3018_s19 = sshll.u32 %s3617_s27, 7 }
  0x77   : > { %s2937_s14 = sshll.u32 %s277_s12, 3  ;;  %s3859_s16 = scalar_lea.hbm %s4426_s0, %s3018_s19 }
  0x78   : > { %s281_s20 = scalar_lea.vmem [#allocation2], %s2937_s14  ;;  %p3863_p11 = pnand %p3256_p5, %p41_p3 }
  0x79   : > { %s288_s1 = sshll.u32 %s281_s20, 4  ;;  %s3867_s22 = scalar_lea.sflag [#allocation3], %s277_s12  ;;  %s3861_s1 = int_to_ptr.vmem [resolvable:$true] %s288_s1 }
  0x7a   : > { %s3513_s23 = scalar_lea.hbm %s3859_s16, 128  ;;  %p3515_p9 = pneg %p3863_p11 }
  0x7b   : > { %p3514_p7 = scmp.ne.s32.totalorder %s3859_s16, %s3513_s23  ;;  %s3518_s15 = scalar_lea.hbm %s4426_s0, 256 }
  0x7c   : > { %p3519_p2 = scmp.lt.u32.totalorder %s3859_s16, %s4426_s0  ;;  %p3520_p1 = scmp.lt.u32.totalorder %s3518_s15, %s3513_s23 }
  0x7d   : > { %p3516_p12 = pnand %p3515_p9, %p3514_p7  ;;  %p3522_p6 = scmp.lt.u32.totalorder %s3513_s23, %s3859_s16 }
  0x7e   : > { %p3521_p13 = por %p3520_p1, %p3519_p2 }
  0x7f   : > { %p3517_p0 = pneg %p3516_p12 }
  0x80   : > { %p3523_p10 = por %p3522_p6, %p3521_p13 }
  0x82   : > { %p3524_p3 = pnand %p3523_p10, %p3517_p0 }
  0x84   : > { %3527 = shalt.err (!%p3524_p3)
}
  0x85   : > { %s3528_s12 = scalar_lea.vmem %s3861_s1, 128  ;;  %s3629_s14 = smov [#allocation2]  }
  0x86   : > { %p3529_p4 = scmp.ne.s32.totalorder %s3861_s1, %s3528_s12  ;;  %s3533_s19 = sshll.u32 %s3629_s14, 4  ;;  %s3534_s19 = int_to_ptr.vmem [resolvable:$false] %s3533_s19 }
  0x87   : > { %s3535_s17 = scalar_lea.vmem %s3534_s19, 256  ;;  %p3536_p12 = scmp.lt.s32.totalorder %s3861_s1, %s3534_s19 }
  0x88   : > { %p3531_p5 = pnand %p3529_p4, %p3515_p9  ;;  %p3537_p2 = scmp.lt.s32.totalorder %s3535_s17, %s3528_s12 }
  0x8a   : > { %p3532_p7 = pneg %p3531_p5  ;;  %p3538_p1 = por %p3537_p2, %p3536_p12 }
  0x8c   : > { %p3539_p13 = pnand %p3538_p1, %p3532_p7 }
  0x8e   : > { %3542 = shalt.err (!%p3539_p13)
}
  0x8f   : > { %3247 = dma.hbm_to_vmem [thread:$0]  (!%p3863_p11), %s3859_s16, 128, %s3861_s1, %s3867_s22, %s3623_s29, %s3623_s29, %s3624_s10  }
  0x90   : > { %p4447_p9 = scmp.ne.s32.totalorder %s4440_s9, 0 }
  0x91   : > { %s3901_s23 = sand.u32 (!%p4447_p9), 1, %s3609_s25   ;;  %p4448_p0 = scmp.ne.s32.totalorder (!%p4447_p9), %s4438_s30, 0 }
  0x92   : > { %300 = sbr.rel (%p4447_p9) target bundleno = 1889 (0x761), region = 48  ;;  %s2941_s15 = sshll.u32 (!%p4447_p9), %s3901_s23, 3 }
  0x93   : > { %s303_s20 = scalar_lea.sflag (!%p4447_p9), [#allocation3], %s3901_s23  ;;  %s3907_s18 = scalar_lea.vmem (!%p4447_p9), [#allocation2], %s2941_s15 }
  0x99   : > { %3588 = dma.done.wait (%p4448_p0), %s303_s20, 128  }
  0x9a   : > { %3590 = vsyncadd (%p4448_p0), %s303_s20, 4294967168  ;;  %p4449_p11 = scmp.eq.s32.totalorder %s3701_s28, 0 }
  0x9c   : > { %3592 = dma.done.wait (%p4449_p11), [#allocation6], 3120   ;;  %p4450_p6 = pmov %p4449_p11 }
  0x9e   : > { %3594 = vsyncadd (%p4450_p6), [#allocation6], 4294964176  ;;  %p4451_p10 = pmov %p4450_p6 }
  0x9f   : > { %p4452_p3 = pmov %p4450_p6 }
  0xa0   : > { %3596 = dma.done.wait (%p4451_p10), [#allocation9], 1280  }
  0xa1   : > { %3598 = vsyncadd (%p4452_p3), [#allocation9], 4294966016  ;;  %v3630_v0 = vmov 0   ;;  %v3328_v1 = vld [vmem:[#allocation5 + $0x4] ss:$12 sps:$4 sm:$0xff]   ;;  %v392_v18 = vlaneseq  ;;  %s3631_s30 = smov 64  }
  0xa2   : > { %573 = vmatprep.mubr.bf16.mxu0 %v3630_v0  ;;  %v3330_v2 = vld [vmem:[#allocation5] ss:$12 sps:$4 sm:$0xff]   ;;  %541 = vmatprep.subr.bf16.mxu0 %v3328_v1  ;;  %v3331_v3 = vld [vmem:[#allocation5 + $0x1c] ss:$12 sps:$4 sm:$0xff]   ;;  %v3333_v4 = vld [vmem:[#allocation5 + $0x18] ss:$12 sps:$4 sm:$0xff]  }
  0xa3   : > { %542 = vmatpush1.bf16.msra.mxu0 %v3330_v2  ;;  %v3334_v5 = vld [vmem:[#allocation5 + $0x34] ss:$12 sps:$4 sm:$0xff]   ;;  %v3336_v6 = vld [vmem:[#allocation5 + $0x30] ss:$12 sps:$4 sm:$0xff]   ;;  %v3337_v7 = vld [vmem:[#allocation5 + $0x4c] ss:$12 sps:$4 sm:$0xff]  }
  0xa4   : > { %543 = vmatprep.subr.bf16.mxu0 %v3331_v3  ;;  %v3339_v8 = vld [vmem:[#allocation5 + $0x48] ss:$12 sps:$4 sm:$0xff]   ;;  %v3340_v9 = vld [vmem:[#allocation5 + $0x64] ss:$12 sps:$4 sm:$0xff]   ;;  %v3342_v10 = vld [vmem:[#allocation5 + $0x60] ss:$12 sps:$4 sm:$0xff]  }
  0xa5   : > { %v3343_v11 = vld [vmem:[#allocation5 + $0x7c] ss:$12 sps:$4 sm:$0xff]   ;;  %v3345_v12 = vld [vmem:[#allocation5 + $0x78] ss:$12 sps:$4 sm:$0xff]   ;;  %v3346_v13 = vld [vmem:[#allocation5 + $0x94] ss:$12 sps:$4 sm:$0xff]  }
  0xa6   : > { %v3348_v14 = vld [vmem:[#allocation5 + $0x90] ss:$12 sps:$4 sm:$0xff]   ;;  %v3349_v15 = vld [vmem:[#allocation5 + $0xac] ss:$12 sps:$4 sm:$0xff]   ;;  %v3351_v16 = vld [vmem:[#allocation5 + $0xa8] ss:$12 sps:$4 sm:$0xff]  }
  0xa7   : > { %544 = vmatpush1.bf16.msra.mxu0 %v3333_v4  ;;  %v3352_v17 = vld [vmem:[%s3907_s18] sm:$0xff]   ;;  %v3922_v19 = vshrl.u32 %v392_v18, 7  ;;  %v3925_v21 = vld [vmem:[#allocation7] sm:$0x7]  ;;  %v3632_v34 = vmov 0.0   ;;  %vm3633_vm0 = vmmov 0  }
  0xa8   : > { %545 = vmatprep.subr.bf16.mxu0 %v3334_v5  ;;  %v3353_v33 = vld [vmem:[#allocation5 + $0x8] ss:$12 sps:$4 sm:$0xff]   ;;  %3075 = vmatprep.subr.bf16.mxu1 %v3632_v34  ;;  %v3354_v35 = vld [vmem:[#allocation5 + $0x20] ss:$12 sps:$4 sm:$0xff]   ;;  %v3355_v36 = vld [vmem:[#allocation5 + $0x38] ss:$12 sps:$4 sm:$0xff]  }
  0xa9   : > { %v398_v20 = vsub.s32 1, %v3922_v19  ;;  %v394_v22 = vsub.s32 0, %v3922_v19  ;;  %3091 = vmatprep.mubr.msk.bf16.mxu1 %vm3633_vm0, %v3632_v34  ;;  %3076 = vmatpush3.bf16.msra.mxu1 %v3353_v33  ;;  %v3356_v37 = vld [vmem:[#allocation5 + $0x50] ss:$12 sps:$4 sm:$0xff]   ;;  %v3357_v38 = vld [vmem:[#allocation5 + $0x68] ss:$12 sps:$4 sm:$0xff]  }
  0xaa   : > { %3077 = vmatprep.subr.bf16.mxu1 %v3632_v34  ;;  %v3358_v39 = vld [vmem:[#allocation5 + $0x80] ss:$12 sps:$4 sm:$0xff]   ;;  %v3359_v40 = vld [vmem:[#allocation5 + $0x98] ss:$12 sps:$4 sm:$0xff]   ;;  %v3360_v41 = vld [vmem:[#allocation5 + $0xb0] ss:$12 sps:$4 sm:$0xff]  }
  0xab   : > { %546 = vmatpush1.bf16.msra.mxu0 %v3336_v6  ;;  %v399_v23 = vrot.slane %v3925_v21, %v398_v20  ;;  %v395_v26 = vrot.slane %v3925_v21, %v394_v22  ;;  %v625_v43 = vld [vmem:[%s4431_s5] sm:$0xff]  ;;  %v627_v44 = vld [vmem:[#allocation10] sm:$0xff]  ;;  %s3634_s10 = smov 96   ;;  %v626_v54 = vld [vmem:[%s4431_s5 + $0x8] sm:$0xff]  ;;  %s3635_s22 = smov 32   ;;  %vm1549_vm1 = vcmask 261120  }
  0xac   : > { %547 = vmatprep.subr.bf16.mxu0 %v3337_v7  ;;  %v628_v53 = vld [vmem:[#allocation10 + $0x8] sm:$0xff]  ;;  %v3636_v62 = vmov 1983009808   ;;  %v3637_v2 = vmov 1934713408   ;;  %vm1918_vm2 = vcmask 64512  }
  0xad   : > { %3078 = vmatpush3.bf16.msra.mxu1 %v3354_v35  ;;  %v672_v63 = vunpack.c.l.s4 %v3636_v62  ;;  %v704_v3 = vunpack.c.l.s4 %v3637_v2  ;;  %vm2018_vm3 = vcmask 1043456   ;;  %vm2682_vm4 = vcmask 523264   ;;  %s352_s19 = scalar_lea.vmem [#allocation11], %s2941_s15  ;;  %s3019_s20 = sshll.u32 %s3701_s28, 7 }
  0xae   : > { %3079 = vmatprep.subr.bf16.mxu1 %v3632_v34  ;;  %vm2685_vm5 = vcmask 785408   ;;  %s2819_s17 = sshll.u32 %s352_s19, 4  ;;  %s4380_s29 = scalar_lea.hbm %s4433_s7, %s3019_s20  ;;  %s4375_s17 = int_to_ptr.vmem [resolvable:$true] %s2819_s17 }
  0xaf   : > { %548 = vmatpush1.bf16.msra.mxu0 %v3339_v8  ;;  %v673_v4 = vunpack.c.0.s8 %v672_v63  ;;  %v705_v7 = vunpack.c.0.s8 %v704_v3  ;;  %s3543_s15 = scalar_lea.vmem %s4375_s17, 128  ;;  %s3638_s28 = smov [#allocation11]  }
  0xb0   : > { %549 = vmatprep.subr.bf16.mxu0 %v3340_v9  ;;  %p3544_p4 = scmp.ne.s32.totalorder %s4375_s17, %s3543_s15  ;;  %s3547_s16 = sshll.u32 %s3638_s28, 4  ;;  %s3548_s16 = int_to_ptr.vmem [resolvable:$false] %s3547_s16 }
  0xb1   : > { %3080 = vmatpush3.bf16.msra.mxu1 %v3355_v36  ;;  %v3982_v20 = vsub.s32 %v705_v7, %v3922_v19  ;;  %s3549_s1 = scalar_lea.vmem %s3548_s16, 256  ;;  %p3550_p12 = scmp.lt.s32.totalorder %s4375_s17, %s3548_s16 }
  0xb2   : > { %3081 = vmatprep.subr.bf16.mxu1 %v3632_v34  ;;  %p3545_p5 = pnand %p3544_p4, %p3849_p8  ;;  %p3551_p2 = scmp.lt.s32.totalorder %s3549_s1, %s3543_s15 }
  0xb3   : > { %550 = vmatpush1.bf16.msra.mxu0 %v3342_v10  ;;  %v3979_v10 = vsub.s32 %v673_v4, %v3922_v19 }
  0xb4   : > { %551 = vmatprep.subr.bf16.mxu0 %v3343_v11  ;;  %p3546_p7 = pneg %p3545_p5  ;;  %p3552_p1 = por %p3551_p2, %p3550_p12 }
  0xb5   : > { %3082 = vmatpush3.bf16.msra.mxu1 %v3356_v37 }
  0xb6   : > { %3083 = vmatprep.subr.bf16.mxu1 %v3632_v34  ;;  %p3553_p13 = pnand %p3552_p1, %p3546_p7 }
  0xb7   : > { %552 = vmatpush1.bf16.msra.mxu0 %v3345_v12 }
  0xb8   : > { %553 = vmatprep.subr.bf16.mxu0 %v3346_v13 }
  0xb9   : > { %3084 = vmatpush3.bf16.msra.mxu1 %v3357_v38 }
  0xba   : > { %3085 = vmatprep.subr.bf16.mxu1 %v3632_v34 }
  0xbb   : > { %554 = vmatpush1.bf16.msra.mxu0 %v3348_v14 }
  0xbc   : > { %555 = vmatprep.subr.bf16.mxu0 %v3349_v15 }
  0xbd   : > { %3086 = vmatpush3.bf16.msra.mxu1 %v3358_v39 }
  0xbe   : > { %3087 = vmatprep.subr.bf16.mxu1 %v3632_v34 }
  0xbf   : > { %556 = vmatpush1.bf16.msra.mxu0 %v3351_v16 }
  0xc0   : > { %3119 = vmatprep.subr.bf16.mxu0 %v3632_v34 }
  0xc1   : > { %3088 = vmatpush3.bf16.msra.mxu1 %v3359_v40 }
  0xc2   : > { %574 = vmatmul.mubr.bf16.vlgmr.msra.gmra.mrb[0].mxu0 %v3352_v17  ;;  %3089 = vmatprep.subr.bf16.mxu1 %v3632_v34 }
  0xc3   : > { %3121 = vmatprep.mubr.msk.bf16.mxu0 %vm3633_vm0, %v3632_v34 }
  0xc5   : > { %3090 = vmatpush3.bf16.msra.mxu1 %v3360_v41 }
  0xc6   : > { %3095 = vmatprep.subr.bf16.mxu1 %v3632_v34 }
  0xc8   : > { %3092 = vmatmul.mubr.bf16.vlgmr.msra.gmra.mrb[0].mxu1 %v3352_v17 }
  0xc9   : > { %3097 = vmatprep.mubr.msk.bf16.mxu1 %vm3633_vm0, %v3632_v34 }
 0x195   : > { %v575_v24 = vpop.f32.mrb[0].mxu0 }
 0x196   : > { %v577_v25 = vpop.f32.mrb[1].mxu0  ;;  %v576_v31 = vadd.f32 %v575_v24, %v395_v26 }
 0x197   : > { %v578_v27 = vadd.f32 %v577_v25, %v399_v23  ;;  %v579_v28 = vpop.f32.mrb[2].mxu0 }
 0x198   : > { %v581_v29 = vpop.f32.mrb[3].mxu0  ;;  %v580_v32 = vadd.f32 %v579_v28, %v395_v26  ;;  %v629_v46 = vmul.f32 %v625_v43, %v576_v31 }
 0x199   : > { %v582_v30 = vadd.f32 %v581_v29, %v399_v23  ;;  %641 = vrot.lane.b32.xlu0 %v578_v27, %s3631_s30  ;;  %v639_v50 = vmul.f32 %v625_v43, %v578_v27 }
 0x19a   : > { %v630_v60 = vmul.f32 %v626_v54, %v580_v32 }
 0x19b   : > { %643 = vrot.lane.b32.xlu1 %v582_v30, %s3631_s30  ;;  %v640_v57 = vmul.f32 %v626_v54, %v582_v30 }
 0x19d   : > { %631 = vrot.lane.b32.xlu0 %v576_v31, %s3631_s30 }
 0x19f   : > { %633 = vrot.lane.b32.xlu1 %v580_v32, %s3631_s30 }
 0x20b   : > { %v642_v42 = vpop.permute.xlu0 %641 }
 0x20c   : > { %v645_v48 = vmul.f32 %v642_v42, %v627_v44 }
 0x20d   : > { %v644_v51 = vpop.permute.xlu1 %643 }
 0x20e   : > { %v647_v52 = vadd.f32 %v645_v48, %v639_v50  ;;  %v646_v55 = vmul.f32 %v644_v51, %v628_v53 }
 0x20f   : > { %v632_v45 = vpop.permute.xlu0 %631 }
 0x210   : > { %v635_v47 = vmul.f32 %v632_v45, %v627_v44  ;;  %v3962_v58 = vadd.f32 %v646_v55, %v640_v57 }
 0x211   : > { %v634_v56 = vpop.permute.xlu1 %633 }
 0x212   : > { %v637_v49 = vadd.f32 %v635_v47, %v629_v46  ;;  %v636_v59 = vmul.f32 %v634_v56, %v628_v53 }
 0x214   : > { %657 = vrot.lane.b32.xlu0 %v637_v49, %s3631_s30  ;;  %651 = vrot.lane.b32.xlu1 %v637_v49, %s3634_s10  ;;  %v3968_v61 = vadd.f32 %v636_v59, %v630_v60 }
 0x218   : > { %951 = vrot.lane.b32.xlu0 %v647_v52, %s3634_s10  ;;  %957 = vrot.lane.b32.xlu1 %v647_v52, %s3631_s30 }
 0x21c   : > { %963 = vrot.lane.b32.xlu0 %v647_v52, %s3635_s22  ;;  %663 = vrot.lane.b32.xlu1 %v637_v49, %s3635_s22 }
 0x220   : > { %953 = vrot.lane.b32.xlu0 %v3962_v58, %s3634_s10  ;;  %959 = vrot.lane.b32.xlu1 %v3962_v58, %s3631_s30 }
 0x224   : > { %965 = vrot.lane.b32.xlu0 %v3962_v58, %s3635_s22  ;;  %653 = vrot.lane.b32.xlu1 %v3968_v61, %s3634_s10 }
 0x228   : > { %659 = vrot.lane.b32.xlu0 %v3968_v61, %s3631_s30  ;;  %665 = vrot.lane.b32.xlu1 %v3968_v61, %s3635_s22 }
 0x286   : > { %v658_v0 = vpop.permute.xlu0 %657  ;;  %v652_v1 = vpop.permute.xlu1 %651 }
 0x287   : > { %v669_v11 = vcombine.low %v637_v49, %v658_v0  ;;  %v670_v12 = vcombine.high %v637_v49, %v658_v0 }
 0x289   : > { %v677_v28 = vrot.slane %v669_v11, %v3979_v10  ;;  %v684_v29 = vrot.slane %v670_v12, %v3979_v10  ;;  %v4026_v12 = vpop.f32.mrb[0].mxu1 }
 0x28a   : > { %v952_v5 = vpop.permute.xlu0 %951  ;;  %v958_v6 = vpop.permute.xlu1 %957 }
 0x28b   : > { %v969_v8 = vcombine.low %v647_v52, %v958_v6  ;;  %v970_v9 = vcombine.high %v647_v52, %v958_v6 }
 0x28d   : > { %v977_v22 = vrot.slane %v969_v8, %v3979_v10  ;;  %v984_v23 = vrot.slane %v970_v9, %v3979_v10 }
 0x28e   : > { %v964_v13 = vpop.permute.xlu0 %963  ;;  %v664_v14 = vpop.permute.xlu1 %663 }
 0x28f   : > { %v985_v15 = vcombine.low %v952_v5, %v964_v13  ;;  %v986_v16 = vcombine.high %v952_v5, %v964_v13  ;;  %v685_v17 = vcombine.low %v652_v1, %v664_v14  ;;  %v686_v18 = vcombine.high %v652_v1, %v664_v14 }
 0x291   : > { %v993_v24 = vrot.slane %v985_v15, %v3979_v10  ;;  %v1000_v25 = vrot.slane %v986_v16, %v3979_v10  ;;  %v693_v26 = vrot.slane %v685_v17, %v3979_v10  ;;  %v700_v27 = vrot.slane %v686_v18, %v3979_v10  ;;  %v3093_v16 = vpop.f32.mrb[1].mxu1 }
 0x292   : > { %v954_v30 = vpop.permute.xlu0 %953  ;;  %v960_v31 = vpop.permute.xlu1 %959 }
 0x293   : > { %v1001_v32 = vcombine.low %v977_v22, %v993_v24  ;;  %v1002_v33 = vcombine.high %v977_v22, %v993_v24  ;;  %v1017_v35 = vcombine.low %v984_v23, %v1000_v25  ;;  %v1018_v36 = vcombine.high %v984_v23, %v1000_v25  ;;  %v4034_v24 = vpop.f32.mrb[2].mxu1 }
 0x294   : > { %v701_v37 = vcombine.low %v677_v28, %v693_v26  ;;  %v702_v38 = vcombine.high %v677_v28, %v693_v26  ;;  %v717_v39 = vcombine.low %v684_v29, %v700_v27  ;;  %v718_v40 = vcombine.high %v684_v29, %v700_v27  ;;  %v3094_v29 = vpop.f32.mrb[3].mxu1 }
 0x295   : > { %v1009_v41 = vrot.slane %v1001_v32, %v3982_v20  ;;  %v1016_v42 = vrot.slane %v1002_v33, %v3982_v20  ;;  %v1025_v43 = vrot.slane %v1017_v35, %v3982_v20  ;;  %v1032_v44 = vrot.slane %v1018_v36, %v3982_v20 }
 0x296   : > { %v709_v45 = vrot.slane %v701_v37, %v3982_v20  ;;  %v716_v46 = vrot.slane %v702_v38, %v3982_v20  ;;  %v725_v47 = vrot.slane %v717_v39, %v3982_v20  ;;  %v732_v48 = vrot.slane %v718_v40, %v3982_v20  ;;  %v966_v49 = vpop.permute.xlu0 %965  ;;  %v654_v50 = vpop.permute.xlu1 %653 }
 0x297   : > { %v1105_v51 = vcombine.low %v1009_v41, %v1016_v42  ;;  %v2976_v52 = vcombine.high %v1009_v41, %v1016_v42  ;;  %v1121_v53 = vcombine.low %v1025_v43, %v1032_v44  ;;  %v2977_v54 = vcombine.high %v1025_v43, %v1032_v44 }
 0x298   : > { %v805_v55 = vcombine.low %v709_v45, %v716_v46  ;;  %v2972_v56 = vcombine.high %v709_v45, %v716_v46  ;;  %v821_v57 = vcombine.low %v725_v47, %v732_v48  ;;  %v2973_v59 = vcombine.high %v725_v47, %v732_v48 }
 0x299   : > { %v4001_v60 = vrot.slane %v1105_v51, %v3979_v10  ;;  %v4004_v62 = vrot.slane %v2976_v52, %v3979_v10  ;;  %v4007_v63 = vrot.slane %v1121_v53, %v3979_v10  ;;  %v4010_v0 = vrot.slane %v2977_v54, %v3979_v10 }
 0x29a   : > { %v1037_v1 = vcombine.low %v3962_v58, %v960_v31  ;;  %v1038_v2 = vcombine.high %v3962_v58, %v960_v31  ;;  %v1053_v3 = vcombine.low %v954_v30, %v966_v49  ;;  %v1054_v4 = vcombine.high %v954_v30, %v966_v49  ;;  %v660_v5 = vpop.permute.xlu0 %659  ;;  %v666_v6 = vpop.permute.xlu1 %665 }
 0x29b   : > { %v4015_v7 = vrot.slane %v805_v55, %v3979_v10  ;;  %v4018_v8 = vrot.slane %v2972_v56, %v3979_v10  ;;  %v4021_v9 = vrot.slane %v821_v57, %v3979_v10  ;;  %v4024_v11 = vrot.slane %v2973_v59, %v3979_v10 }
 0x29c   : > { %v1045_v58 = vrot.slane %v1037_v1, %v3979_v10  ;;  %v1052_v13 = vrot.slane %v1038_v2, %v3979_v10  ;;  %v1061_v14 = vrot.slane %v1053_v3, %v3979_v10  ;;  %v1068_v15 = vrot.slane %v1054_v4, %v3979_v10 }
 0x29d   : > { %v737_v17 = vcombine.low %v3968_v61, %v660_v5  ;;  %v738_v18 = vcombine.high %v3968_v61, %v660_v5  ;;  %v753_v22 = vcombine.low %v654_v50, %v666_v6  ;;  %v754_v23 = vcombine.high %v654_v50, %v666_v6 }
 0x29e   : > { %v1069_v25 = vcombine.low %v1045_v58, %v1061_v14  ;;  %v1070_v26 = vcombine.high %v1045_v58, %v1061_v14  ;;  %v1085_v27 = vcombine.low %v1052_v13, %v1068_v15  ;;  %v1086_v28 = vcombine.high %v1052_v13, %v1068_v15 }
 0x29f   : > { %v745_v30 = vrot.slane %v737_v17, %v3979_v10  ;;  %v752_v31 = vrot.slane %v738_v18, %v3979_v10  ;;  %v761_v32 = vrot.slane %v753_v22, %v3979_v10  ;;  %v768_v33 = vrot.slane %v754_v23, %v3979_v10 }
 0x2a0   : > { %v1077_v35 = vrot.slane %v1069_v25, %v3982_v20  ;;  %v1084_v61 = vrot.slane %v1070_v26, %v3982_v20  ;;  %v1093_v36 = vrot.slane %v1085_v27, %v3982_v20  ;;  %v1100_v37 = vrot.slane %v1086_v28, %v3982_v20 }
 0x2a1   : > { %v769_v38 = vcombine.low %v745_v30, %v761_v32  ;;  %v770_v39 = vcombine.high %v745_v30, %v761_v32  ;;  %v785_v40 = vcombine.low %v752_v31, %v768_v33  ;;  %v786_v41 = vcombine.high %v752_v31, %v768_v33 }
 0x2a2   : > { %v1173_v42 = vcombine.low %v1077_v35, %v1084_v61  ;;  %v2978_v43 = vcombine.high %v1077_v35, %v1084_v61  ;;  %v1189_v44 = vcombine.low %v1093_v36, %v1100_v37  ;;  %v2979_v45 = vcombine.high %v1093_v36, %v1100_v37 }
 0x2a3   : > { %v777_v46 = vrot.slane %v769_v38, %v3982_v20  ;;  %v784_v47 = vrot.slane %v770_v39, %v3982_v20  ;;  %v793_v48 = vrot.slane %v785_v40, %v3982_v20  ;;  %v800_v49 = vrot.slane %v786_v41, %v3982_v20 }
 0x2a4   : > { %v837_v50 = vcombine.low %v4015_v7, %v4018_v8  ;;  %v838_v51 = vcombine.high %v4015_v7, %v4018_v8  ;;  %v853_v52 = vcombine.low %v4021_v9, %v4024_v11  ;;  %v854_v53 = vcombine.high %v4021_v9, %v4024_v11 }
 0x2a5   : > { %v873_v54 = vcombine.low %v777_v46, %v784_v47  ;;  %v2974_v55 = vcombine.high %v777_v46, %v784_v47  ;;  %v889_v56 = vcombine.low %v793_v48, %v800_v49  ;;  %v2975_v57 = vcombine.high %v793_v48, %v800_v49 }
 0x2a6   : > { %v1137_v59 = vcombine.low %v4001_v60, %v4004_v62  ;;  %v1153_v1 = vcombine.low %v4007_v63, %v4010_v0  ;;  %v1138_v2 = vcombine.high %v4001_v60, %v4004_v62  ;;  %v1154_v3 = vcombine.high %v4007_v63, %v4010_v0 }
 0x2a7   : > { %v4065_v4 = vrot.slane %v1173_v42, %v3979_v10  ;;  %v4068_v5 = vrot.slane %v2978_v43, %v3979_v10  ;;  %v4071_v6 = vrot.slane %v1189_v44, %v3979_v10  ;;  %v4074_v7 = vrot.slane %v2979_v45, %v3979_v10 }
 0x2a8   : > { %v1145_v8 = vrot.slane %v1137_v59, %v3982_v20  ;;  %v1161_v9 = vrot.slane %v1153_v1, %v3982_v20  ;;  %v1152_v60 = vrot.slane %v1138_v2, %v3982_v20  ;;  %v1168_v62 = vrot.slane %v1154_v3, %v3982_v20 }
 0x2a9   : > { %v4081_v63 = vrot.slane %v873_v54, %v3979_v10  ;;  %v4084_v0 = vrot.slane %v2974_v55, %v3979_v10  ;;  %v4087_v11 = vrot.slane %v889_v56, %v3979_v10  ;;  %v4090_v58 = vrot.slane %v2975_v57, %v3979_v10 }
 0x2aa   : > { %v1169_v13 = vcombine.low %v1145_v8, %v1161_v9  ;;  %v1171_v14 = vcombine.low %v1152_v60, %v1168_v62  ;;  %v845_v15 = vrot.slane %v837_v50, %v3982_v20  ;;  %v861_v16 = vrot.slane %v853_v52, %v3982_v20 }
 0x2ab   : > { %v1205_v17 = vcombine.low %v4065_v4, %v4068_v5  ;;  %v1221_v18 = vcombine.low %v4071_v6, %v4074_v7  ;;  %v852_v25 = vrot.slane %v838_v51, %v3982_v20  ;;  %v868_v26 = vrot.slane %v854_v53, %v3982_v20 }
 0x2ac   : > { %v1241_v22 = vpack.c.bf16 %v1169_v13, %v1169_v13  ;;  %v1245_v23 = vpack.c.bf16 %v1171_v14, %v1171_v14  ;;  %v402_v29 = vsub.s32 2, %v3922_v19  ;;  %v1172_v32 = vcombine.high %v1152_v60, %v1168_v62 }
 0x2ad   : > { %v1213_v27 = vrot.slane %v1205_v17, %v3982_v20  ;;  %v1229_v28 = vrot.slane %v1221_v18, %v3982_v20  ;;  %v905_v33 = vcombine.low %v4081_v63, %v4084_v0  ;;  %v921_v61 = vcombine.low %v4087_v11, %v4090_v58 }
 0x2ae   : > { %v1554_v30 = vsel %vm1549_vm1, %v1241_v22, 0  ;;  %v1738_v31 = vsel %vm1549_vm1, %v1245_v23, 0  ;;  %v869_v36 = vcombine.low %v845_v15, %v861_v16  ;;  %v871_v37 = vcombine.low %v852_v25, %v868_v26 }
 0x2af   : > { %3096 = vmatpush3.bf16.xpose.msra.mxu1 %v1554_v30  ;;  %3120 = vmatpush3.bf16.xpose.msra.mxu0 %v1738_v31  ;;  %v1237_v35 = vcombine.low %v1213_v27, %v1229_v28  ;;  %v403_v38 = vrot.slane %v3925_v21, %v402_v29  ;;  %v1247_v39 = vpack.c.bf16 %v1172_v32, %v1172_v32 }
 0x2b0   : > { %3101 = vmatprep.subr.bf16.mxu1 %v3632_v34  ;;  %3131 = vmatprep.subr.bf16.mxu0 %v3632_v34  ;;  %v913_v40 = vrot.slane %v905_v33, %v3982_v20  ;;  %v941_v41 = vpack.c.bf16 %v869_v36, %v869_v36  ;;  %v945_v42 = vpack.c.bf16 %v871_v37, %v871_v37 }
 0x2b1   : > { %v1242_v19 = vpack.c.bf16 %v1237_v35, %v1237_v35  ;;  %v929_v44 = vrot.slane %v921_v61, %v3982_v20  ;;  %v4116_v45 = vadd.f32 %v4026_v12, %v403_v38  ;;  %v4119_v46 = vadd.f32 %v4034_v24, %v403_v38 }
 0x2b2   : > { %v1830_v21 = vsel %vm1549_vm1, %v1247_v39, 0  ;;  %v1170_v47 = vcombine.high %v1145_v8, %v1161_v9  ;;  %v872_v48 = vcombine.high %v852_v25, %v868_v26  ;;  %v1238_v52 = vcombine.high %v1213_v27, %v1229_v28 }
 0x2b3   : > { %v1600_v43 = vsel %vm1549_vm1, %v1242_v19, 0  ;;  %v937_v12 = vcombine.low %v913_v40, %v929_v44  ;;  %1251 = vrot.lane.b32.xlu1 %v4116_v45, %s3634_s10  ;;  %v1206_v53 = vcombine.high %v4065_v4, %v4068_v5  ;;  %v1222_v54 = vcombine.high %v4071_v6, %v4074_v7 }
 0x2b4   : > { %v1243_v24 = vpack.c.bf16 %v1170_v47, %v1170_v47  ;;  %v947_v50 = vpack.c.bf16 %v872_v48, %v872_v48  ;;  %v870_v55 = vcombine.high %v845_v15, %v861_v16  ;;  %v1244_v56 = vpack.c.bf16 %v1238_v52, %v1238_v52 }
 0x2b5   : > { %v942_v49 = vpack.c.bf16 %v937_v12, %v937_v12  ;;  %v1220_v57 = vrot.slane %v1206_v53, %v3982_v20  ;;  %v1236_v59 = vrot.slane %v1222_v54, %v3982_v20  ;;  %v906_v4 = vcombine.high %v4081_v63, %v4084_v0 }
 0x2b6   : > { %3098 = vmatmul.mubr.msk.bf16.vlgmr.msra.gmra.mrb[4].mxu1 %vm1549_vm1, %v941_v41  ;;  %3122 = vmatmul.mubr.msk.bf16.vlgmr.msra.gmra.mrb[4].mxu0 %vm1549_vm1, %v945_v42  ;;  %v1646_v51 = vsel %vm1549_vm1, %v1243_v24, 0  ;;  %v943_v1 = vpack.c.bf16 %v870_v55, %v870_v55  ;;  %v1692_v2 = vsel %vm1549_vm1, %v1244_v56, 0  ;;  %v922_v5 = vcombine.high %v4087_v11, %v4090_v58 }
 0x2b7   : > { %3102 = vmatpush3.bf16.xpose.msra.mxu1 %v1600_v43  ;;  %3132 = vmatpush3.bf16.xpose.msra.mxu0 %v1830_v21  ;;  %v1239_v3 = vcombine.low %v1220_v57, %v1236_v59  ;;  %v938_v6 = vcombine.high %v913_v40, %v929_v44  ;;  %v920_v9 = vrot.slane %v906_v4, %v3982_v20 }
 0x2b8   : > { %3103 = vmatprep.mubr.msk.bf16.mxu1 %vm3633_vm0, %v3632_v34  ;;  %3133 = vmatprep.mubr.msk.bf16.mxu0 %vm3633_vm0, %v3632_v34  ;;  %v936_v60 = vrot.slane %v922_v5, %v3982_v20  ;;  %v1240_v13 = vcombine.high %v1220_v57, %v1236_v59 }
 0x2b9   : > { %3107 = vmatprep.subr.bf16.mxu1 %v3632_v34  ;;  %3143 = vmatprep.subr.bf16.mxu0 %v3632_v34  ;;  %v1246_v7 = vpack.c.bf16 %v1239_v3, %v1239_v3  ;;  %v944_v8 = vpack.c.bf16 %v938_v6, %v938_v6 }
 0x2ba   : > { %v939_v63 = vcombine.low %v920_v9, %v936_v60  ;;  %v1248_v0 = vpack.c.bf16 %v1240_v13, %v1240_v13  ;;  %v940_v14 = vcombine.high %v920_v9, %v936_v60 }
 0x2bb   : > { %v1784_v62 = vsel %vm1549_vm1, %v1246_v7, 0 }
 0x2bc   : > { %v946_v11 = vpack.c.bf16 %v939_v63, %v939_v63  ;;  %v1876_v58 = vsel %vm1549_vm1, %v1248_v0, 0  ;;  %v948_v15 = vpack.c.bf16 %v940_v14, %v940_v14 }
 0x2be   : > { %3104 = vmatmul.mubr.msk.bf16.vlgmr.msra.gmra.mrb[8].mxu1 %vm1549_vm1, %v942_v49  ;;  %3134 = vmatmul.mubr.msk.bf16.vlgmr.msra.gmra.mrb[8].mxu0 %vm1549_vm1, %v947_v50 }
 0x2bf   : > { %3108 = vmatpush3.bf16.xpose.msra.mxu1 %v1646_v51  ;;  %3109 = vmatprep.mubr.msk.bf16.mxu1 %vm3633_vm0, %v3632_v34 }
 0x2c0   : > { %3113 = vmatprep.subr.bf16.mxu1 %v3632_v34  ;;  %3145 = vmatprep.mubr.msk.bf16.mxu0 %vm3633_vm0, %v3632_v34 }
 0x2c6   : > { %3110 = vmatmul.mubr.msk.bf16.vlgmr.msra.gmra.mrb[12].mxu1 %vm1549_vm1, %v943_v1 }
 0x2c7   : > { %3114 = vmatpush3.bf16.xpose.msra.mxu1 %v1692_v2  ;;  %3115 = vmatprep.mubr.msk.bf16.mxu1 %vm3633_vm0, %v3632_v34 }
 0x2c8   : > { %3125 = vmatprep.subr.bf16.mxu1 %v3632_v34 }
 0x2ce   : > { %3116 = vmatmul.mubr.msk.bf16.vlgmr.msra.gmra.mrb[16].mxu1 %vm1549_vm1, %v944_v8 }
 0x2cf   : > { %3126 = vmatpush3.bf16.xpose.msra.mxu1 %v1784_v62  ;;  %3127 = vmatprep.mubr.msk.bf16.mxu1 %vm3633_vm0, %v3632_v34 }
 0x2d0   : > { %3137 = vmatprep.subr.bf16.mxu1 %v3632_v34 }
 0x2d6   : > { %3128 = vmatmul.mubr.msk.bf16.vlgmr.msra.gmra.mrb[20].mxu1 %vm1549_vm1, %v946_v11 }
 0x2d7   : > { %3138 = vmatpush3.bf16.xpose.msra.mxu1 %v1876_v58  ;;  %3139 = vmatprep.mubr.msk.bf16.mxu1 %vm3633_vm0, %v3632_v34 }
 0x2d8   : > { %3149 = vmatprep.subr.bf16.mxu1 %v3632_v34 }
 0x2de   : > { %3140 = vmatmul.mubr.msk.bf16.vlgmr.msra.gmra.mrb[24].mxu1 %vm1549_vm1, %v948_v15 }
 0x2df   : > { %3151 = vmatprep.mubr.msk.bf16.mxu1 %vm3633_vm0, %v3632_v34 }
 0x325   : > { %v4187_v59 = vpop.permute.xlu1 %1251 }
 0x389   : > { %v1590_v16 = vpop.f32.mrb[4].mxu1  ;;  %v4170_v17 = vpop.f32.mrb[4].mxu0 }
 0x38a   : > { %v3099_v18 = vpop.f32.mrb[5].mxu1  ;;  %v3123_v22 = vpop.f32.mrb[5].mxu0  ;;  %v1931_v23 = vsel %vm1918_vm2, %v4170_v17, -inf  ;;  %v1919_v25 = vsel %vm1918_vm2, %v1590_v16, -inf }
 0x38b   : > { %1932 = vmax.xlane.f32.xlu1 %v1931_v23  ;;  %v1777_v26 = vpop.f32.mrb[6].mxu0  ;;  %1920 = vmax.xlane.f32.xlu0 %v1919_v25  ;;  %v1593_v27 = vpop.f32.mrb[6].mxu1 }
 0x38c   : > { %v3100_v28 = vpop.f32.mrb[7].mxu1  ;;  %v3124_v29 = vpop.f32.mrb[7].mxu0 }
 0x391   : > { %v1636_v30 = vpop.f32.mrb[8].mxu1  ;;  %v1866_v31 = vpop.f32.mrb[8].mxu0 }
 0x392   : > { %v3105_v32 = vpop.f32.mrb[9].mxu1  ;;  %v3135_v33 = vpop.f32.mrb[9].mxu0  ;;  %v1922_v35 = vsel %vm1918_vm2, %v1636_v30, -inf  ;;  %v1937_v38 = vsel %vm1918_vm2, %v1866_v31, -inf }
 0x393   : > { %v1869_v61 = vpop.f32.mrb[10].mxu0  ;;  %1923 = vmax.xlane.f32.xlu1 %v1922_v35  ;;  %v1639_v36 = vpop.f32.mrb[10].mxu1 }
 0x394   : > { %v3106_v37 = vpop.f32.mrb[11].mxu1  ;;  %v3136_v19 = vpop.f32.mrb[11].mxu0 }
 0x397   : > { %1938 = vmax.xlane.f32.xlu1 %v1937_v38 }
 0x399   : > { %v1682_v39 = vpop.f32.mrb[12].mxu1 }
 0x39a   : > { %v3111_v40 = vpop.f32.mrb[13].mxu1  ;;  %v1925_v41 = vsel %vm1918_vm2, %v1682_v39, -inf }
 0x39b   : > { %1926 = vmax.xlane.f32.xlu0 %v1925_v41  ;;  %v1685_v42 = vpop.f32.mrb[14].mxu1 }
 0x39c   : > { %v3112_v43 = vpop.f32.mrb[15].mxu1 }
 0x3a1   : > { %v1728_v44 = vpop.f32.mrb[16].mxu1 }
 0x3a2   : > { %v3117_v21 = vpop.f32.mrb[17].mxu1  ;;  %v1928_v47 = vsel %vm1918_vm2, %v1728_v44, -inf }
 0x3a3   : > { %1929 = vmax.xlane.f32.xlu0 %v1928_v47  ;;  %v1731_v12 = vpop.f32.mrb[18].mxu1 }
 0x3a4   : > { %v3118_v48 = vpop.f32.mrb[19].mxu1 }
 0x3a8   : > { %1257 = vrot.lane.b32.xlu1 %v4116_v45, %s3631_s30 }
 0x3a9   : > { %v1820_v24 = vpop.f32.mrb[20].mxu1 }
 0x3aa   : > { %v3129_v49 = vpop.f32.mrb[21].mxu1  ;;  %v1934_v50 = vsel %vm1918_vm2, %v1820_v24, -inf }
 0x3ab   : > { %1935 = vmax.xlane.f32.xlu0 %v1934_v50  ;;  %v1823_v51 = vpop.f32.mrb[22].mxu1 }
 0x3ac   : > { %1259 = vrot.lane.b32.xlu1 %v4119_v46, %s3631_s30  ;;  %v3130_v52 = vpop.f32.mrb[23].mxu1 }
 0x3b1   : > { %v1912_v53 = vpop.f32.mrb[24].mxu1 }
 0x3b2   : > { %v3141_v54 = vpop.f32.mrb[25].mxu1  ;;  %v1940_v55 = vsel %vm1918_vm2, %v1912_v53, -inf }
 0x3b3   : > { %1941 = vmax.xlane.f32.xlu0 %v1940_v55  ;;  %v1915_v56 = vpop.f32.mrb[26].mxu1 }
 0x3b4   : > { %v3142_v57 = vpop.f32.mrb[27].mxu1 }
 0x3c9   : > { %1253 = vrot.lane.b32.xlu0 %v4119_v46, %s3634_s10 }
 0x418   : > { %v1921_v1 = vpop.xlane.xlu0 %1920  ;;  %v1933_v4 = vpop.xlane.xlu1 %1932 }
 0x419   : > { %v1943_v2 = vsub.f32 %v1590_v16, %v1921_v1  ;;  %v1947_v18 = vsub.f32 %v4170_v17, %v1933_v4 }
 0x41b   : > { %v1951_v3 = vmul.f32 1.442695, %v1943_v2  ;;  %v1959_v25 = vmul.f32 1.442695, %v1947_v18 }
 0x41d   : > { %3369 = vpow2.f32 %v1951_v3 }
 0x420   : > { %v1924_v5 = vpop.xlane.xlu1 %1923 }
 0x421   : > { %v1944_v6 = vsub.f32 %v1636_v30, %v1924_v5 }
 0x423   : > { %v1953_v7 = vmul.f32 1.442695, %v1944_v6 }
 0x424   : > { %v1939_v11 = vpop.xlane.xlu1 %1938 }
 0x425   : > { %3371 = vpow2.f32 %v1953_v7  ;;  %v1949_v58 = vsub.f32 %v1866_v31, %v1939_v11 }
 0x427   : > { %v4189_v8 = vpop.eup %3369  ;;  %v1963_v15 = vmul.f32 1.442695, %v1949_v58 }
 0x428   : > { %v1967_v9 = vsel %vm1918_vm2, %v4189_v8, 0.0  ;;  %v1927_v13 = vpop.xlane.xlu0 %1926  ;;  %v1258_v41 = vpop.permute.xlu1 %1257 }
 0x429   : > { %1968 = vadd.xlane.f32.xlu1 %v1967_v9  ;;  %v1945_v16 = vsub.f32 %v1682_v39, %v1927_v13  ;;  %v1269_v4 = vcombine.low %v4116_v45, %v1258_v41  ;;  %v1270_v5 = vcombine.high %v4116_v45, %v1258_v41 }
 0x42b   : > { %v1955_v22 = vmul.f32 1.442695, %v1945_v16  ;;  %v1284_v16 = vrot.slane %v1270_v5, %v3979_v10 }
 0x42c   : > { %v1260_v42 = vpop.permute.xlu1 %1259 }
 0x42d   : > { %v1338_v21 = vcombine.high %v4119_v46, %v1260_v42 }
 0x42f   : > { %v4193_v60 = vpop.eup %3371  ;;  %v1352_v50 = vrot.slane %v1338_v21, %v3979_v10 }
 0x430   : > { %v1970_v62 = vsel %vm1918_vm2, %v4193_v60, 0.0  ;;  %v1930_v63 = vpop.xlane.xlu0 %1929 }
 0x431   : > { %1971 = vadd.xlane.f32.xlu0 %v1970_v62  ;;  %v1946_v0 = vsub.f32 %v1728_v44, %v1930_v63  ;;  %v1337_v44 = vcombine.low %v4119_v46, %v1260_v42 }
 0x433   : > { %v1957_v14 = vmul.f32 1.442695, %v1946_v0  ;;  %v1345_v49 = vrot.slane %v1337_v44, %v3979_v10 }
 0x435   : > { %3373 = vpow2.f32 %v1957_v14 }
 0x436   : > { %3375 = vpow2.f32 %v1963_v15  ;;  %v1277_v15 = vrot.slane %v1269_v4, %v3979_v10 }
 0x437   : > { %3377 = vpow2.f32 %v1955_v22 }
 0x438   : > { %v1936_v23 = vpop.xlane.xlu0 %1935  ;;  %3379 = vpow2.f32 %v1959_v25 }
 0x439   : > { %v1948_v26 = vsub.f32 %v1820_v24, %v1936_v23 }
 0x43a   : > { %1265 = vrot.lane.b32.xlu1 %v4119_v46, %s3635_s22 }
 0x43b   : > { %v1961_v29 = vmul.f32 1.442695, %v1948_v26 }
 0x43d   : > { %3381 = vpow2.f32 %v1961_v29 }
 0x43f   : > { %v4202_v28 = vpop.eup %3373 }
 0x440   : > { %v1942_v27 = vpop.xlane.xlu0 %1941  ;;  %v1976_v31 = vsel %vm1918_vm2, %v4202_v28, 0.0  ;;  %v4206_v32 = vpop.eup %3375 }
 0x441   : > { %v1950_v30 = vsub.f32 %v1912_v53, %v1942_v27  ;;  %v1985_v33 = vsel %vm1918_vm2, %v4206_v32, 0.0  ;;  %v4210_v35 = vpop.eup %3377 }
 0x442   : > { %v1973_v61 = vsel %vm1918_vm2, %v4210_v35, 0.0  ;;  %v4214_v36 = vpop.eup %3379 }
 0x443   : > { %v1965_v17 = vmul.f32 1.442695, %v1950_v30  ;;  %v1979_v37 = vsel %vm1918_vm2, %v4214_v36, 0.0 }
 0x444   : > { %v1254_v47 = vpop.permute.xlu0 %1253 }
 0x445   : > { %3383 = vpow2.f32 %v1965_v17 }
 0x447   : > { %1263 = vrot.lane.b32.xlu0 %v4116_v45, %s3635_s22  ;;  %v4218_v19 = vpop.eup %3381 }
 0x448   : > { %v1982_v38 = vsel %vm1918_vm2, %v4218_v19, 0.0 }
 0x44f   : > { %v4222_v39 = vpop.eup %3383 }
 0x450   : > { %v1988_v40 = vsel %vm1918_vm2, %v4222_v39, 0.0 }
 0x45e   : > { %1977 = vadd.xlane.f32.xlu1 %v1976_v31 }
 0x462   : > { %1986 = vadd.xlane.f32.xlu1 %v1985_v33 }
 0x466   : > { %1974 = vadd.xlane.f32.xlu0 %v1973_v61 }
 0x46a   : > { %1980 = vadd.xlane.f32.xlu0 %v1979_v37 }
 0x46e   : > { %1983 = vadd.xlane.f32.xlu0 %v1982_v38 }
 0x472   : > { %1989 = vadd.xlane.f32.xlu0 %v1988_v40 }
 0x4b6   : > { %v1969_v43 = vpop.xlane.xlu1 %1968 }
 0x4ba   : > { %v1266_v12 = vpop.permute.xlu1 %1265 }
 0x4bb   : > { %v1353_v48 = vcombine.low %v1254_v47, %v1266_v12  ;;  %v1354_v24 = vcombine.high %v1254_v47, %v1266_v12 }
 0x4bd   : > { %v1361_v51 = vrot.slane %v1353_v48, %v3979_v10  ;;  %v1368_v52 = vrot.slane %v1354_v24, %v3979_v10 }
 0x4be   : > { %v1972_v53 = vpop.xlane.xlu0 %1971 }
 0x4bf   : > { %v1369_v54 = vcombine.low %v1345_v49, %v1361_v51  ;;  %v1370_v55 = vcombine.high %v1345_v49, %v1361_v51  ;;  %v1385_v56 = vcombine.low %v1352_v50, %v1368_v52  ;;  %v1386_v57 = vcombine.high %v1352_v50, %v1368_v52 }
 0x4c0   : > { %3385 = vrcp.f32 %v1972_v53 }
 0x4c1   : > { %v1377_v46 = vrot.slane %v1369_v54, %v3982_v20  ;;  %v1384_v1 = vrot.slane %v1370_v55, %v3982_v20  ;;  %v1393_v2 = vrot.slane %v1385_v56, %v3982_v20  ;;  %v1400_v3 = vrot.slane %v1386_v57, %v3982_v20 }
 0x4c2   : > { %v1264_v6 = vpop.permute.xlu0 %1263  ;;  %3387 = vrcp.f32 %v1969_v43 }
 0x4c3   : > { %v1473_v7 = vcombine.low %v1377_v46, %v1384_v1  ;;  %v2982_v9 = vcombine.high %v1377_v46, %v1384_v1  ;;  %v1489_v62 = vcombine.low %v1393_v2, %v1400_v3  ;;  %v2983_v13 = vcombine.high %v1393_v2, %v1400_v3 }
 0x4c4   : > { %v1285_v63 = vcombine.low %v4187_v59, %v1264_v6  ;;  %v1286_v0 = vcombine.high %v4187_v59, %v1264_v6 }
 0x4c5   : > { %v4241_v11 = vrot.slane %v1473_v7, %v3979_v10  ;;  %v4244_v58 = vrot.slane %v2982_v9, %v3979_v10  ;;  %v4247_v14 = vrot.slane %v1489_v62, %v3979_v10  ;;  %v4250_v45 = vrot.slane %v2983_v13, %v3979_v10 }
 0x4c6   : > { %v1293_v18 = vrot.slane %v1285_v63, %v3979_v10  ;;  %v1300_v59 = vrot.slane %v1286_v0, %v3979_v10 }
 0x4c7   : > { %v1505_v22 = vcombine.low %v4241_v11, %v4244_v58  ;;  %v1521_v23 = vcombine.low %v4247_v14, %v4250_v45  ;;  %v1522_v13 = vcombine.high %v4247_v14, %v4250_v45 }
 0x4c8   : > { %v1301_v25 = vcombine.low %v1277_v15, %v1293_v18  ;;  %v1302_v26 = vcombine.high %v1277_v15, %v1293_v18  ;;  %v1317_v27 = vcombine.low %v1284_v16, %v1300_v59  ;;  %v1318_v29 = vcombine.high %v1284_v16, %v1300_v59 }
 0x4c9   : > { %v1513_v30 = vrot.slane %v1505_v22, %v3982_v20  ;;  %v1529_v31 = vrot.slane %v1521_v23, %v3982_v20  ;;  %v1536_v0 = vrot.slane %v1522_v13, %v3982_v20 }
 0x4ca   : > { %v3386_v17 = vpop.eup %3385  ;;  %v1309_v33 = vrot.slane %v1301_v25, %v3982_v20  ;;  %v1316_v61 = vrot.slane %v1302_v26, %v3982_v20  ;;  %v1325_v37 = vrot.slane %v1317_v27, %v3982_v20  ;;  %v1332_v38 = vrot.slane %v1318_v29, %v3982_v20 }
 0x4cb   : > { %v1537_v40 = vcombine.low %v1513_v30, %v1529_v31  ;;  %v1538_v41 = vcombine.high %v1513_v30, %v1529_v31  ;;  %v2000_v47 = vmul.f32 %v3386_v17, %v4193_v60 }
 0x4cc   : > { %v1405_v42 = vcombine.low %v1309_v33, %v1316_v61  ;;  %v2980_v44 = vcombine.high %v1309_v33, %v1316_v61  ;;  %v1421_v21 = vcombine.low %v1325_v37, %v1332_v38  ;;  %v2981_v43 = vcombine.high %v1325_v37, %v1332_v38  ;;  %v3388_v57 = vpop.eup %3387 }
 0x4cd   : > { %v1542_v12 = vpack.c.bf16 %v1537_v40, %v1537_v40  ;;  %v1544_v52 = vpack.c.bf16 %v1538_v41, %v1538_v41  ;;  %v2008_v55 = vpack.c.bf16 %v2000_v47, %v2000_v47  ;;  %v1999_v3 = vmul.f32 %v3388_v57, %v4189_v8 }
 0x4ce   : > { %v1412_v48 = vrot.slane %v1405_v42, %v3979_v10  ;;  %v1420_v24 = vrot.slane %v2980_v44, %v3979_v10  ;;  %v1428_v49 = vrot.slane %v1421_v21, %v3979_v10  ;;  %v1436_v50 = vrot.slane %v2981_v43, %v3979_v10 }
 0x4cf   : > { %v2066_v51 = vsel %vm2018_vm3, %v1542_v12, 0  ;;  %v2158_v46 = vsel %vm2018_vm3, %v1544_v52, 0  ;;  %v2007_v7 = vpack.c.bf16 %v1999_v3, %v1999_v3  ;;  %v1506_v8 = vcombine.high %v4241_v11, %v4244_v58 }
 0x4d0   : > { %3150 = vmatpush3.bf16.msra.mxu1 %v2066_v51  ;;  %v1437_v53 = vcombine.low %v1412_v48, %v1420_v24  ;;  %v1453_v54 = vcombine.low %v1428_v49, %v1436_v50  ;;  %v1438_v18 = vcombine.high %v1412_v48, %v1420_v24  ;;  %v1454_v59 = vcombine.high %v1428_v49, %v1436_v50 }
 0x4d1   : > { %3161 = vmatprep.subr.bf16.mxu1 %v3632_v34  ;;  %v1520_v63 = vrot.slane %v1506_v8, %v3982_v20 }
 0x4d2   : > { %v1445_v60 = vrot.slane %v1437_v53, %v3982_v20  ;;  %v1461_v56 = vrot.slane %v1453_v54, %v3982_v20  ;;  %v1452_v11 = vrot.slane %v1438_v18, %v3982_v20  ;;  %v1468_v58 = vrot.slane %v1454_v59, %v3982_v20  ;;  %v3363_v53 = vld [vmem:[#allocation8 + $0x10] sm:$0xff]   ;;  %v3364_v54 = vld [vmem:[#allocation8 + $0x18] sm:$0xff]  }
 0x4d3   : > { %3152 = vmatmul.mubr.msk.bf16.vlgmr.msra.gmra.mrb[28].mxu1 %vm1918_vm2, %v2008_v55  ;;  %v1539_v16 = vcombine.low %v1520_v63, %v1536_v0  ;;  %v1540_v41 = vcombine.high %v1520_v63, %v1536_v0  ;;  %v3365_v55 = vld [vmem:[#allocation8 + $0x20] sm:$0xff]  }
 0x4d4   : > { %3162 = vmatpush3.bf16.msra.mxu1 %v2158_v46  ;;  %v1469_v1 = vcombine.low %v1445_v60, %v1461_v56  ;;  %v1470_v2 = vcombine.high %v1445_v60, %v1461_v56  ;;  %3163 = vmatprep.mubr.msk.bf16.mxu1 %vm3633_vm0, %v3632_v34  ;;  %v1471_v29 = vcombine.low %v1452_v11, %v1468_v58  ;;  %v3366_v60 = vld [vmem:[#allocation8 + $0x28] sm:$0xff]  }
 0x4d5   : > { %3173 = vmatprep.subr.bf16.mxu1 %v3632_v34  ;;  %v1546_v26 = vpack.c.bf16 %v1539_v16, %v1539_v16  ;;  %v1472_v40 = vcombine.high %v1452_v11, %v1468_v58  ;;  %v1548_v43 = vpack.c.bf16 %v1540_v41, %v1540_v41 }
 0x4d6   : > { %v1541_v4 = vpack.c.bf16 %v1469_v1, %v1469_v1  ;;  %v1543_v6 = vpack.c.bf16 %v1470_v2, %v1470_v2  ;;  %v1545_v33 = vpack.c.bf16 %v1471_v29, %v1471_v29 }
 0x4d7   : > { %v2250_v27 = vsel %vm2018_vm3, %v1546_v26, 0  ;;  %v1547_v21 = vpack.c.bf16 %v1472_v40, %v1472_v40  ;;  %v2342_v50 = vsel %vm2018_vm3, %v1548_v43, 0 }
 0x4d8   : > { %v2020_v5 = vsel %vm2018_vm3, %v1541_v4, 0  ;;  %v2112_v9 = vsel %vm2018_vm3, %v1543_v6, 0  ;;  %v2204_v38 = vsel %vm2018_vm3, %v1545_v33, 0 }
 0x4d9   : > { %3144 = vmatpush3.bf16.msra.mxu0 %v2020_v5  ;;  %v2296_v49 = vsel %vm2018_vm3, %v1547_v21, 0 }
 0x4da   : > { %3155 = vmatprep.subr.bf16.mxu0 %v3632_v34 }
 0x4dc   : > { %3146 = vmatmul.mubr.msk.bf16.vlgmr.msra.gmra.mrb[12].mxu0 %vm1918_vm2, %v2007_v7 }
 0x4dd   : > { %3156 = vmatpush3.bf16.msra.mxu0 %v2112_v9  ;;  %3157 = vmatprep.mubr.msk.bf16.mxu0 %vm3633_vm0, %v3632_v34 }
 0x4de   : > { %3167 = vmatprep.subr.bf16.mxu0 %v3632_v34 }
 0x4eb   : > { %v1978_v62 = vpop.xlane.xlu1 %1977 }
 0x4ec   : > { %3389 = vrcp.f32 %v1978_v62 }
 0x4ef   : > { %v1987_v30 = vpop.xlane.xlu1 %1986 }
 0x4f3   : > { %v1975_v15 = vpop.xlane.xlu0 %1974 }
 0x4f4   : > { %3391 = vrcp.f32 %v1975_v15 }
 0x4f6   : > { %v3390_v22 = vpop.eup %3389 }
 0x4f7   : > { %v2002_v23 = vmul.f32 %v3390_v22, %v4202_v28  ;;  %v1981_v25 = vpop.xlane.xlu0 %1980 }
 0x4f8   : > { %3393 = vrcp.f32 %v1981_v25 }
 0x4f9   : > { %v2010_v14 = vpack.c.bf16 %v2002_v23, %v2002_v23 }
 0x4fb   : > { %v1984_v45 = vpop.xlane.xlu0 %1983  ;;  %3164 = vmatmul.mubr.msk.bf16.vlgmr.msra.gmra.mrb[32].mxu1 %vm1918_vm2, %v2010_v14 }
 0x4fc   : > { %3395 = vrcp.f32 %v1984_v45  ;;  %3174 = vmatpush3.bf16.msra.mxu1 %v2250_v27  ;;  %3175 = vmatprep.mubr.msk.bf16.mxu1 %vm3633_vm0, %v3632_v34 }
 0x4fd   : > { %3185 = vmatprep.subr.bf16.mxu1 %v3632_v34  ;;  %3397 = vrcp.f32 %v1987_v30 }
 0x4fe   : > { %v3392_v28 = vpop.eup %3391 }
 0x4ff   : > { %v2001_v31 = vmul.f32 %v3392_v28, %v4210_v35  ;;  %v1990_v17 = vpop.xlane.xlu0 %1989 }
 0x500   : > { %3399 = vrcp.f32 %v1990_v17 }
 0x501   : > { %v2009_v61 = vpack.c.bf16 %v2001_v31, %v2001_v31 }
 0x502   : > { %v3394_v37 = vpop.eup %3393 }
 0x503   : > { %3158 = vmatmul.mubr.msk.bf16.vlgmr.msra.gmra.mrb[16].mxu0 %vm1918_vm2, %v2009_v61  ;;  %v2003_v42 = vmul.f32 %v3394_v37, %v4214_v36 }
 0x504   : > { %3168 = vmatpush3.bf16.msra.mxu0 %v2204_v38  ;;  %3169 = vmatprep.mubr.msk.bf16.mxu0 %vm3633_vm0, %v3632_v34 }
 0x505   : > { %3179 = vmatprep.subr.bf16.mxu0 %v3632_v34  ;;  %v2011_v12 = vpack.c.bf16 %v2003_v42, %v2003_v42 }
 0x506   : > { %v3396_v35 = vpop.eup %3395 }
 0x507   : > { %v2004_v44 = vmul.f32 %v3396_v35, %v4218_v19  ;;  %v3398_v47 = vpop.eup %3397 }
 0x508   : > { %v2005_v36 = vmul.f32 %v3398_v47, %v4206_v32  ;;  %v3361_v32 = vld [vmem:[#allocation8] sm:$0xff]  }
 0x509   : > { %v2012_v48 = vpack.c.bf16 %v2004_v44, %v2004_v44 }
 0x50a   : > { %v3400_v24 = vpop.eup %3399  ;;  %v2013_v51 = vpack.c.bf16 %v2005_v36, %v2005_v36 }
 0x50b   : > { %3170 = vmatmul.mubr.msk.bf16.vlgmr.msra.gmra.mrb[20].mxu0 %vm1918_vm2, %v2011_v12  ;;  %3176 = vmatmul.mubr.msk.bf16.vlgmr.msra.gmra.mrb[36].mxu1 %vm1918_vm2, %v2012_v48  ;;  %v2006_v19 = vmul.f32 %v3400_v24, %v4222_v39  ;;  %v3362_v39 = vld [vmem:[#allocation8 + $0x8] sm:$0xff]  }
 0x50c   : > { %3180 = vmatpush3.bf16.msra.mxu0 %v2296_v49  ;;  %3186 = vmatpush3.bf16.msra.mxu1 %v2342_v50 }
 0x50d   : > { %3181 = vmatprep.mubr.msk.bf16.mxu0 %vm3633_vm0, %v3632_v34  ;;  %3187 = vmatprep.mubr.msk.bf16.mxu1 %vm3633_vm0, %v3632_v34  ;;  %v2014_v52 = vpack.c.bf16 %v2006_v19, %v2006_v19 }
 0x50e   : > { %3191 = vmatprep.subr.bf16.mxu0 %v3632_v34 }
 0x513   : > { %3182 = vmatmul.mubr.msk.bf16.vlgmr.msra.gmra.mrb[24].mxu0 %vm1918_vm2, %v2013_v51  ;;  %3188 = vmatmul.mubr.msk.bf16.vlgmr.msra.gmra.mrb[40].mxu1 %vm1918_vm2, %v2014_v52 }
 0x514   : > { %3207 = vmatprep.mubr.msk.bf16.mxu0 %vm3633_vm0, %v3632_v34  ;;  %3192 = vmatpush3.bf16.msra.mxu0 %v3361_v32 }
 0x515   : > { %3193 = vmatprep.subr.bf16.mxu0 %v3632_v34 }
 0x518   : > { %3194 = vmatpush3.bf16.msra.mxu0 %v3362_v39 }
 0x519   : > { %3195 = vmatprep.subr.bf16.mxu0 %v3632_v34 }
 0x51c   : > { %3196 = vmatpush3.bf16.msra.mxu0 %v3363_v53 }
 0x51d   : > { %3197 = vmatprep.subr.bf16.mxu0 %v3632_v34 }
 0x520   : > { %3198 = vmatpush3.bf16.msra.mxu0 %v3364_v54 }
 0x521   : > { %3199 = vmatprep.subr.bf16.mxu0 %v3632_v34 }
 0x524   : > { %3200 = vmatpush3.bf16.msra.mxu0 %v3365_v55 }
 0x525   : > { %3201 = vmatprep.subr.bf16.mxu0 %v3632_v34 }
 0x528   : > { %3202 = vmatpush3.bf16.msra.mxu0 %v3366_v60 }
 0x529   : > { %3203 = vmatprep.subr.bf16.mxu0 %v3632_v34 }
 0x5a6   : > { %v2102_v56 = vpop.f32.mrb[28].mxu1 }
 0x5a7   : > { %v3153_v57 = vpop.f32.mrb[29].mxu1 }
 0x5a8   : > { %v2105_v46 = vpop.f32.mrb[30].mxu1 }
 0x5a9   : > { %v3154_v1 = vpop.f32.mrb[31].mxu1 }
 0x5af   : > { %v2056_v2 = vpop.f32.mrb[12].mxu0 }
 0x5b0   : > { %v3147_v3 = vpop.f32.mrb[13].mxu0 }
 0x5b1   : > { %v2059_v4 = vpop.f32.mrb[14].mxu0 }
 0x5b2   : > { %v3148_v5 = vpop.f32.mrb[15].mxu0 }
 0x5ce   : > { %v2194_v6 = vpop.f32.mrb[32].mxu1 }
 0x5cf   : > { %v3165_v7 = vpop.f32.mrb[33].mxu1 }
 0x5d0   : > { %v2197_v9 = vpop.f32.mrb[34].mxu1 }
 0x5d1   : > { %v3166_v62 = vpop.f32.mrb[35].mxu1 }
 0x5d6   : > { %v2148_v8 = vpop.f32.mrb[16].mxu0 }
 0x5d7   : > { %v3159_v13 = vpop.f32.mrb[17].mxu0 }
 0x5d8   : > { %v2151_v63 = vpop.f32.mrb[18].mxu0 }
 0x5d9   : > { %v3160_v0 = vpop.f32.mrb[19].mxu0 }
 0x5da   : > { %v3367_v0 = vld [vmem:[#allocation8 + $0x30] sm:$0xff]  }
 0x5db   : > { %3204 = vmatpush3.bf16.msra.mxu0 %v3367_v0 }
 0x5dc   : > { %3205 = vmatprep.subr.bf16.mxu0 %v3632_v34 }
 0x5de   : > { %v2240_v15 = vpop.f32.mrb[20].mxu0  ;;  %v2286_v16 = vpop.f32.mrb[36].mxu1 }
 0x5df   : > { %v2384_v18 = vcombine.low %v2056_v2, %v2240_v15  ;;  %v2385_v59 = vcombine.high %v2056_v2, %v2240_v15  ;;  %v2452_v22 = vcombine.low %v2102_v56, %v2286_v16  ;;  %v2453_v23 = vcombine.high %v2102_v56, %v2286_v16  ;;  %v3171_v25 = vpop.f32.mrb[21].mxu0  ;;  %v3177_v26 = vpop.f32.mrb[37].mxu1 }
 0x5e0   : > { %v2243_v11 = vpop.f32.mrb[22].mxu0  ;;  %v2289_v58 = vpop.f32.mrb[38].mxu1 }
 0x5e1   : > { %v3172_v14 = vpop.f32.mrb[23].mxu0  ;;  %v3178_v45 = vpop.f32.mrb[39].mxu1  ;;  %v2392_v37 = vrot.slane %v2384_v18, %v3979_v10  ;;  %v2399_v38 = vrot.slane %v2385_v59, %v3979_v10  ;;  %v2460_v12 = vrot.slane %v2452_v22, %v3979_v10  ;;  %v2467_v48 = vrot.slane %v2453_v23, %v3979_v10 }
 0x5e6   : > { %v2332_v27 = vpop.f32.mrb[24].mxu0  ;;  %v2378_v29 = vpop.f32.mrb[40].mxu1 }
 0x5e7   : > { %v2400_v30 = vcombine.low %v2148_v8, %v2332_v27  ;;  %v2401_v28 = vcombine.high %v2148_v8, %v2332_v27  ;;  %v2468_v31 = vcombine.low %v2194_v6, %v2378_v29  ;;  %v2469_v17 = vcombine.high %v2194_v6, %v2378_v29  ;;  %v3183_v33 = vpop.f32.mrb[25].mxu0  ;;  %v3189_v61 = vpop.f32.mrb[41].mxu1 }
 0x5e8   : > { %v2335_v40 = vpop.f32.mrb[26].mxu0  ;;  %v2381_v41 = vpop.f32.mrb[42].mxu1  ;;  %v3368_v61 = vld [vmem:[#allocation8 + $0x38] sm:$0xff]  }
 0x5e9   : > { %v2408_v42 = vrot.slane %v2400_v30, %v3979_v10  ;;  %v2415_v35 = vrot.slane %v2401_v28, %v3979_v10  ;;  %v2476_v44 = vrot.slane %v2468_v31, %v3979_v10  ;;  %v2483_v21 = vrot.slane %v2469_v17, %v3979_v10  ;;  %v3184_v43 = vpop.f32.mrb[27].mxu0  ;;  %v3190_v47 = vpop.f32.mrb[43].mxu1  ;;  %3206 = vmatpush3.bf16.msra.mxu0 %v3368_v61 }
 0x5eb   : > { %v2416_v24 = vcombine.low %v2392_v37, %v2408_v42  ;;  %v2417_v49 = vcombine.high %v2392_v37, %v2408_v42  ;;  %v2432_v50 = vcombine.low %v2399_v38, %v2415_v35  ;;  %v2433_v36 = vcombine.high %v2399_v38, %v2415_v35 }
 0x5ec   : > { %v2484_v19 = vcombine.low %v2460_v12, %v2476_v44  ;;  %v2485_v51 = vcombine.high %v2460_v12, %v2476_v44  ;;  %v2500_v52 = vcombine.low %v2467_v48, %v2483_v21  ;;  %v2501_v32 = vcombine.high %v2467_v48, %v2483_v21 }
 0x5ed   : > { %v2424_v39 = vrot.slane %v2416_v24, %v3982_v20  ;;  %v2431_v53 = vrot.slane %v2417_v49, %v3982_v20  ;;  %v2440_v54 = vrot.slane %v2432_v50, %v3982_v20  ;;  %v2447_v55 = vrot.slane %v2433_v36, %v3982_v20 }
 0x5ee   : > { %v2492_v60 = vrot.slane %v2484_v19, %v3982_v20  ;;  %v2499_v56 = vrot.slane %v2485_v51, %v3982_v20  ;;  %v2508_v57 = vrot.slane %v2500_v52, %v3982_v20  ;;  %v2515_v46 = vrot.slane %v2501_v32, %v3982_v20 }
 0x5ef   : > { %v2520_v1 = vcombine.low %v2424_v39, %v2431_v53  ;;  %v3000_v2 = vcombine.high %v2424_v39, %v2431_v53  ;;  %v2536_v3 = vcombine.low %v2440_v54, %v2447_v55  ;;  %v3001_v4 = vcombine.high %v2440_v54, %v2447_v55 }
 0x5f0   : > { %v2588_v5 = vcombine.low %v2492_v60, %v2499_v56  ;;  %v3002_v6 = vcombine.high %v2492_v60, %v2499_v56  ;;  %v2604_v7 = vcombine.low %v2508_v57, %v2515_v46  ;;  %v3003_v9 = vcombine.high %v2508_v57, %v2515_v46  ;;  %v3004_v56 = vld [vmem:[%s4430_s4] ss:$0 sm:$0xff] }
 0x5f1   : > { %v2527_v62 = vrot.slane %v2520_v1, %v3979_v10  ;;  %v2535_v8 = vrot.slane %v3000_v2, %v3979_v10  ;;  %v2543_v13 = vrot.slane %v2536_v3, %v3979_v10  ;;  %v2551_v63 = vrot.slane %v3001_v4, %v3979_v10 }
 0x5f2   : > { %v2595_v15 = vrot.slane %v2588_v5, %v3979_v10  ;;  %v2603_v16 = vrot.slane %v3002_v6, %v3979_v10  ;;  %v2611_v18 = vrot.slane %v2604_v7, %v3979_v10  ;;  %v2619_v59 = vrot.slane %v3003_v9, %v3979_v10 }
 0x5f3   : > { %v2553_v22 = vcombine.high %v2527_v62, %v2535_v8  ;;  %v2569_v23 = vcombine.high %v2543_v13, %v2551_v63  ;;  %v2552_v25 = vcombine.low %v2527_v62, %v2535_v8  ;;  %v2568_v26 = vcombine.low %v2543_v13, %v2551_v63 }
 0x5f4   : > { %v2621_v11 = vcombine.high %v2595_v15, %v2603_v16  ;;  %v2637_v58 = vcombine.high %v2611_v18, %v2619_v59  ;;  %v2620_v14 = vcombine.low %v2595_v15, %v2603_v16  ;;  %v2636_v45 = vcombine.low %v2611_v18, %v2619_v59 }
 0x5f5   : > { %v2567_v27 = vrot.slane %v2553_v22, %v3982_v20  ;;  %v2583_v29 = vrot.slane %v2569_v23, %v3982_v20  ;;  %v2560_v30 = vrot.slane %v2552_v25, %v3982_v20  ;;  %v2576_v28 = vrot.slane %v2568_v26, %v3982_v20 }
 0x5f6   : > { %v2635_v10 = vrot.slane %v2621_v11, %v3982_v20  ;;  %v2651_v31 = vrot.slane %v2637_v58, %v3982_v20  ;;  %v2628_v17 = vrot.slane %v2620_v14, %v3982_v20  ;;  %v2644_v33 = vrot.slane %v2636_v45, %v3982_v20 }
 0x5f7   : > { %v2586_v37 = vcombine.low %v2567_v27, %v2583_v29  ;;  %v2585_v38 = vcombine.high %v2560_v30, %v2576_v28  ;;  %v2584_v34 = vcombine.low %v2560_v30, %v2576_v28  ;;  %v2587_v40 = vcombine.high %v2567_v27, %v2583_v29 }
 0x5f8   : > { %v2654_v41 = vcombine.low %v2635_v10, %v2651_v31  ;;  %v2652_v42 = vcombine.low %v2628_v17, %v2644_v33  ;;  %v2653_v35 = vcombine.high %v2628_v17, %v2644_v33  ;;  %v2655_v44 = vcombine.high %v2635_v10, %v2651_v31 }
 0x5fa   : > { %v3318_v21 = vpack.i.bf16 %v2654_v41, %v2586_v37  ;;  %v3313_v43 = vpack.i.bf16 %v2653_v35, %v2585_v38  ;;  %v3323_v47 = vpack.i.bf16 %v2655_v44, %v2587_v40 }
 0x5fc   : > { %3319 = vrot.lane.b32.xlu0 %v3318_v21, %s3631_s30  ;;  %3314 = vrot.lane.b32.xlu1 %v3313_v43, %s3635_s22 }
 0x600   : > { %3324 = vrot.lane.b32.xlu1 %v3323_v47, %s3634_s10  ;;  %s2806_s10 = scalar_lea.sflag [#allocation4], %s3901_s23 }
 0x66e   : > { %v3320_v20 = vpop.permute.xlu0 %3319  ;;  %v3315_v12 = vpop.permute.xlu1 %3314 }
 0x66f   : > { %v3317_v48 = vunpack.i.h.bf16 %v3315_v12  ;;  %v3316_v24 = vunpack.i.l.bf16 %v3315_v12  ;;  %v3322_v49 = vunpack.i.h.bf16 %v3320_v20  ;;  %v3321_v50 = vunpack.i.l.bf16 %v3320_v20 }
 0x671   : > { %v2681_v36 = vsel %vm1549_vm1, %v2652_v42, %v3317_v48  ;;  %v2680_v19 = vsel %vm1549_vm1, %v2584_v34, %v3316_v24 }
 0x672   : > { %v3325_v51 = vpop.permute.xlu1 %3324  ;;  %v2683_v39 = vsel %vm2682_vm4, %v2680_v19, %v3321_v50  ;;  %v2684_v53 = vsel %vm2682_vm4, %v2681_v36, %v3322_v49 }
 0x673   : > { %v3327_v52 = vunpack.i.h.bf16 %v3325_v51  ;;  %v3326_v32 = vunpack.i.l.bf16 %v3325_v51 }
 0x675   : > { %v2686_v54 = vsel %vm2685_vm5, %v2683_v39, %v3326_v32  ;;  %v2687_v55 = vsel %vm2685_vm5, %v2684_v53, %v3327_v52 }
 0x676   : > { %v2688_v60 = vpack.c.bf16 %v2687_v55, %v2686_v54 }
 0x678   : > { %3208 = vmatmul.mubr.bf16.vlgmr.msra.gmra.mrb[28].mxu0 %v2688_v60 }
 0x74b   : > { %v2794_v57 = vpop.f32.mrb[28].mxu0 }
 0x74c   : > { %v3209_v46 = vpop.f32.mrb[29].mxu0  ;;  %v2795_v2 = vadd.f32 %v3004_v56, %v2794_v57 }
 0x74d   : > { %v2797_v1 = vpop.f32.mrb[30].mxu0 }
 0x74e   : > { %v2798_v3 = vadd.f32 %v3004_v56, %v2797_v1  ;;  %v3210_v4 = vpop.f32.mrb[31].mxu0 }
 0x750   : > { %v3023_v5 = vpack.c.bf16 %v2798_v3, %v2795_v2 }
 0x752   : > { %3024 = vst [vmem:[%s352_s19] sm:$0xff] %v3023_v5  }
 0x753   : > { %3556 = shalt.err (!%p3553_p13)
}
 0x754   : > { %s3557_s22 = scalar_lea.hbm %s4380_s29, 128  ;;  %s3561_s19 = scalar_lea.hbm %s4433_s7, 256 }
 0x755   : > { %p3558_p9 = scmp.ne.s32.totalorder %s4380_s29, %s3557_s22  ;;  %p3562_p6 = scmp.lt.u32.totalorder %s4380_s29, %s4433_s7 }
 0x756   : > { %p3563_p10 = scmp.lt.u32.totalorder %s3561_s19, %s3557_s22  ;;  %p3565_p4 = scmp.lt.u32.totalorder %s3557_s22, %s4380_s29 }
 0x757   : > { %p3559_p0 = pnand %p3558_p9, %p3849_p8 }
 0x758   : > { %p3564_p3 = por %p3563_p10, %p3562_p6 }
 0x759   : > { %p3560_p11 = pneg %p3559_p0 }
 0x75a   : > { %p3566_p5 = por %p3565_p4, %p3564_p3 }
 0x75c   : > { %p3567_p7 = pnand %p3566_p5, %p3560_p11 }
 0x75e   : > { %3570 = shalt.err (!%p3567_p7)
}
 0x75f   : > { %s3639_s9 = smov 4  }
 0x760   : > { %3229 = dma.vmem_to_hbm [thread:$0]  (%p3849_p8), %s4375_s17, 128, %s4380_s29, %s2806_s10, %s3631_s30, %s3631_s30, %s3639_s9  }
 0x761 PF: > { %s2834_s15 = sand.u32 1, %s3605_s24   ;;  %p4453_p12 = scmp.ne.s32.totalorder %s4439_s8, 0 }
 0x762   : > { %p4454_p2 = scmp.ge.s32.totalorder %s3617_s27, 2  ;;  %s2835_s28 = scalar_lea.sflag [#allocation4], %s2834_s15 }
 0x764   : > { %p3249_p1 = pnand %p4454_p2, %p4453_p12 }
 0x766   : > { %3600 = dma.done.wait (!%p3249_p1), %s2835_s28, 128  }
 0x767   : > { %3602 = vsyncadd (!%p3249_p1), %s2835_s28, 4294967168  ;;  %p22_p13 = scmp.ge.s32.totalorder %s3836_s21, 4   ;;  %s4455_s24 = smov %s3609_s25 }
 0x768   : > { %s4456_s25 = smov %s3613_s26  ;;  %s4457_s26 = smov %s3845_s11 }
 0x769   : > { %s4458_s27 = smov %s3836_s21  ;;  %24 = sbr.rel (!%p22_p13) target bundleno = 9 (0x9), region = 109 }
 0x770   :  { %2840 = vsyncpa [#allocation3], 1 }
 0x771   :  { %2842 = vsyncpa [#allocation3 + $0x1], 1 }
 0x772   :  { %2843 = vsyncpa [#allocation6], 1 }
 0x773   :  { %2844 = vsyncpa [#allocation9], 1 }
 0x774   :  { %2845 = vsyncpa [#allocation4], 1 }
 0x775   :  { %2847 = vsyncpa [#allocation4 + $0x1], 1 }

</bundles_post_ra>
